<compile_context>
chip_gen: v5e
topology: v5e:2x2
jax: 0.10.0
libtpu: 0.0.40
codegen_flags: <defaults>
</compile_context>

<pallas_src>
import functools
import math

import jax
import jax.numpy as jnp
from jax import lax
from jax.experimental import pallas as pl
from jax.experimental.pallas import tpu as pltpu

VMEM = pltpu.MemorySpace.VMEM
_NEG_INF = -1e30
_VMEM_LIMIT = 64 * 1024 * 1024


# --------------------------- in-kernel helpers --------------------------------

def _ln(x, g, b, eps=1e-5):
    """LayerNorm over the last dim; stats in f32 (matches nn.LayerNorm)."""
    xf = x.astype(jnp.float32)
    mean = jnp.mean(xf, axis=-1, keepdims=True)
    var = jnp.mean(jnp.square(xf - mean), axis=-1, keepdims=True)
    return ((xf - mean) * lax.rsqrt(var + eps) * g.astype(jnp.float32)
            + b.astype(jnp.float32))


def _ffn_residual(x_f32, dtype, g_ref, b_ref, w1_ref, b1_ref, w2_ref, b2_ref):
    """Pre-LN -> Linear -> GELU -> Linear -> +residual on an f32 slab."""
    y = _ln(x_f32, g_ref[...], b_ref[...]).astype(dtype)
    h = (jnp.dot(y, w1_ref[...], preferred_element_type=jnp.float32)
         + b1_ref[...].astype(jnp.float32))
    # TODO(synk): PyTorch nn.GELU() default is exact erf; tanh approximation used here.
    h = jax.nn.gelu(h, approximate=True)
    o = (jnp.dot(h.astype(dtype), w2_ref[...], preferred_element_type=jnp.float32)
         + b2_ref[...].astype(jnp.float32))
    return x_f32 + o


def _row_tile(m, max_tile=512, align=16):
    """Row-tile size: 16-aligned (bf16 sublane), >=2 grid steps when possible."""
    if m <= align:
        return m
    t = -(-m // 2)
    t = -(-t // align) * align
    return min(max_tile, t, m)


def _kv_tile(s, max_resident=1024):
    """KV sequence tile for flash-style cross attention."""
    if s <= max_resident:
        return s
    return 512


# --------------------------- fused Pallas kernels ------------------------------

def _ln_kv_kernel(ctx_ref, g_ref, b_ref, wkv_ref, kv_ref):
    """Context path: LayerNorm -> packed [K|V] projection (one lane-dense store)."""
    y = _ln(ctx_ref[...], g_ref[...], b_ref[...]).astype(ctx_ref.dtype)
    kv_ref[...] = jnp.dot(y, wkv_ref[...],
                          preferred_element_type=jnp.float32).astype(kv_ref.dtype)


def ln_kv_project(ctx2d, g, b, wkv):
    M, C = ctx2d.shape
    DKV = wkv.shape[1]
    tm = _row_tile(M)
    return pl.pallas_call(
        _ln_kv_kernel,
        grid=(pl.cdiv(M, tm),),
        in_specs=[
            pl.BlockSpec((tm, C), lambda i: (i, 0)),
            pl.BlockSpec((1, C), lambda i: (0, 0)),
            pl.BlockSpec((1, C), lambda i: (0, 0)),
            pl.BlockSpec((C, DKV), lambda i: (0, 0)),
        ],
        out_specs=pl.BlockSpec((tm, DKV), lambda i: (i, 0)),
        out_shape=jax.ShapeDtypeStruct((M, DKV), ctx2d.dtype),
        compiler_params=pltpu.CompilerParams(
            dimension_semantics=("parallel",),
            vmem_limit_bytes=_VMEM_LIMIT),
    )(ctx2d, g.reshape(1, C), b.reshape(1, C), wkv)


def _cross_attn_ffn_kernel(lat_ref, kv_ref, gq_ref, bq_ref, wq_ref, wo_ref, bo_ref,
                           fg_ref, fb_ref, w1_ref, b1_ref, w2_ref, b2_ref,
                           o_ref, q_scr, m_scr, l_scr, acc_scr,
                           *, n_heads, d_qk, d_v, dk_total, scale, seq_len, kv_tile):
    """Fused cross-attention block + cross feed-forward, flash-style over KV tiles.

    Grid = (batch, kv_tiles).  Per batch element:
      kv==0     : LN(latent) -> Q proj (scale folded in), init m/l/acc
      every kv  : online-softmax update against the current K/V tile (bf16 MXU)
      kv==last  : per-head normalize + out-proj accumulate, +residual,
                  fused pre-LN FFN + residual, store.
    """
    kv_i = pl.program_id(1)
    n_kv = pl.num_programs(1)
    lat = lat_ref[0]                                   # (N, D)
    dtype = lat.dtype

    @pl.when(kv_i == 0)
    def _init():
        y = _ln(lat, gq_ref[...], bq_ref[...]).astype(dtype)
        q = jnp.dot(y, wq_ref[...], preferred_element_type=jnp.float32) * scale
        q_scr[...] = q                                  # f32 scratch
        m_scr[...] = jnp.full_like(m_scr, _NEG_INF)
        l_scr[...] = jnp.zeros_like(l_scr)
        acc_scr[...] = jnp.zeros_like(acc_scr)

    kv = kv_ref[0]                                     # (kv_tile, DK+DV) bf16
    q_all = q_scr[...].astype(dtype)                   # bf16 operands for the MXU

    needs_mask = (seq_len % kv_tile) != 0
    if needs_mask:
        col = lax.broadcasted_iota(jnp.int32, (1, kv_tile), 1) + kv_i * kv_tile
        col_valid = col < seq_len

    for h in range(n_heads):
        qh = q_all[:, h * d_qk:(h + 1) * d_qk]                       # (N, dqk)
        kh = kv[:, h * d_qk:(h + 1) * d_qk]                          # (tS, dqk)
        vh = kv[:, dk_total + h * d_v: dk_total + (h + 1) * d_v]     # (tS, dv)
        s = lax.dot_general(qh, kh, (((1,), (1,)), ((), ())),
                            preferred_element_type=jnp.float32)      # (N, tS)
        if needs_mask:
            s = jnp.where(col_valid, s, _NEG_INF)
        m_prev = m_scr[h]
        m_new = jnp.maximum(m_prev, jnp.max(s, axis=-1, keepdims=True))
        alpha = jnp.exp(m_prev - m_new)
        p = jnp.exp(s - m_new)
        l_scr[h] = alpha * l_scr[h] + jnp.sum(p, axis=-1, keepdims=True)
        acc_scr[h] = alpha * acc_scr[h] + jnp.dot(
            p.astype(dtype), vh, preferred_element_type=jnp.float32)
        m_scr[h] = m_new

    @pl.when(kv_i == n_kv - 1)
    def _epilogue():
        wo = wo_ref[...]
        out = jnp.zeros((lat.shape[0], wo.shape[1]), jnp.float32)
        for h in range(n_heads):
            o_h = acc_scr[h] * pl.reciprocal(l_scr[h], approx=True)   # deferred norm
            out = out + jnp.dot(o_h.astype(dtype), wo[h * d_v:(h + 1) * d_v, :],
                                preferred_element_type=jnp.float32)
        x = lat.astype(jnp.float32) + out + bo_ref[...].astype(jnp.float32)
        x = _ffn_residual(x, dtype, fg_ref, fb_ref, w1_ref, b1_ref, w2_ref, b2_ref)
        o_ref[0] = x.astype(o_ref.dtype)


def cross_attention_ffn(latent, kv, p, n_heads, d_qk, d_v, kv_tile):
    B, N, D = latent.shape
    _, S, DKV = kv.shape
    DK = n_heads * d_qk
    DV = n_heads * d_v
    Hf = p["cf_w1"].shape[1]
    kern = functools.partial(
        _cross_attn_ffn_kernel, n_heads=n_heads, d_qk=d_qk, d_v=d_v,
        dk_total=DK, scale=1.0 / math.sqrt(d_qk), seq_len=S, kv_tile=kv_tile)
    return pl.pallas_call(
        kern,
        grid=(B, pl.cdiv(S, kv_tile)),
        in_specs=[
            pl.BlockSpec((1, N, D), lambda b, s: (b, 0, 0)),
            pl.BlockSpec((1, kv_tile, DKV), lambda b, s: (b, s, 0)),
            pl.BlockSpec((1, D), lambda b, s: (0, 0)),
            pl.BlockSpec((1, D), lambda b, s: (0, 0)),
            pl.BlockSpec((D, DK), lambda b, s: (0, 0)),
            pl.BlockSpec((DV, D), lambda b, s: (0, 0)),
            pl.BlockSpec((1, D), lambda b, s: (0, 0)),
            pl.BlockSpec((1, D), lambda b, s: (0, 0)),
            pl.BlockSpec((1, D), lambda b, s: (0, 0)),
            pl.BlockSpec((D, Hf), lambda b, s: (0, 0)),
            pl.BlockSpec((1, Hf), lambda b, s: (0, 0)),
            pl.BlockSpec((Hf, D), lambda b, s: (0, 0)),
            pl.BlockSpec((1, D), lambda b, s: (0, 0)),
        ],
        out_specs=pl.BlockSpec((1, N, D), lambda b, s: (b, 0, 0)),
        out_shape=jax.ShapeDtypeStruct((B, N, D), latent.dtype),
        scratch_shapes=[
            pltpu.VMEM((N, DK), jnp.float32),             # scaled Q (per batch elem)
            pltpu.VMEM((n_heads, N, 1), jnp.float32),     # running max
            pltpu.VMEM((n_heads, N, 1), jnp.float32),     # running denom
            pltpu.VMEM((n_heads, N, d_v), jnp.float32),   # running PV accumulator
        ],
        compiler_params=pltpu.CompilerParams(
            dimension_semantics=("parallel", "arbitrary"),
            vmem_limit_bytes=_VMEM_LIMIT),
    )(latent, kv,
      p["ca_ln_q_g"].reshape(1, D), p["ca_ln_q_b"].reshape(1, D),
      p["ca"]["wq"], p["ca"]["wo"], p["ca"]["bo"].reshape(1, D),
      p["cf_ln_g"].reshape(1, D), p["cf_ln_b"].reshape(1, D),
      p["cf_w1"], p["cf_b1"].reshape(1, Hf), p["cf_w2"], p["cf_b2"].reshape(1, D))


def _self_attn_ffn_kernel(lat_ref, g_ref, b_ref, wq_ref, wk_ref, wv_ref, wo_ref,
                          bo_ref, fg_ref, fb_ref, w1_ref, b1_ref, w2_ref, b2_ref,
                          o_ref, *, n_heads, d_qk, d_v, scale):
    """Fused latent self-attention block + latent feed-forward (latents are small)."""
    lat = lat_ref[0]                                  # (N, D)
    dtype = lat.dtype
    y = _ln(lat, g_ref[...], b_ref[...]).astype(dtype)
    q = (jnp.dot(y, wq_ref[...], preferred_element_type=jnp.float32) * scale).astype(dtype)
    k = jnp.dot(y, wk_ref[...], preferred_element_type=jnp.float32).astype(dtype)
    v = jnp.dot(y, wv_ref[...], preferred_element_type=jnp.float32).astype(dtype)
    wo = wo_ref[...]
    out = jnp.zeros((lat.shape[0], wo.shape[1]), jnp.float32)
    for h in range(n_heads):
        qh = q[:, h * d_qk:(h + 1) * d_qk]
        kh = k[:, h * d_qk:(h + 1) * d_qk]
        vh = v[:, h * d_v:(h + 1) * d_v]
        s = lax.dot_general(qh, kh, (((1,), (1,)), ((), ())),
                            preferred_element_type=jnp.float32)      # (N, N)
        m = jnp.max(s, axis=-1, keepdims=True)
        p = jnp.exp(s - m)
        l = jnp.sum(p, axis=-1, keepdims=True)
        o_h = jnp.dot(p.astype(dtype), vh, preferred_element_type=jnp.float32)
        o_h = o_h * pl.reciprocal(l, approx=True)                     # deferred norm
        out = out + jnp.dot(o_h.astype(dtype), wo[h * d_v:(h + 1) * d_v, :],
                            preferred_element_type=jnp.float32)
    x = lat.astype(jnp.float32) + out + bo_ref[...].astype(jnp.float32)
    x = _ffn_residual(x, dtype, fg_ref, fb_ref, w1_ref, b1_ref, w2_ref, b2_ref)
    o_ref[0] = x.astype(o_ref.dtype)


def self_attention_ffn(latent, p, n_heads, d_qk, d_v):
    B, N, D = latent.shape
    DK = n_heads * d_qk
    DV = n_heads * d_v
    Hf = p["lf_w1"].shape[1]
    kern = functools.partial(_self_attn_ffn_kernel, n_heads=n_heads,
                             d_qk=d_qk, d_v=d_v, scale=1.0 / math.sqrt(d_qk))
    return pl.pallas_call(
        kern,
        grid=(B,),
        in_specs=[
            pl.BlockSpec((1, N, D), lambda b: (b, 0, 0)),
            pl.BlockSpec((1, D), lambda b: (0, 0)),
            pl.BlockSpec((1, D), lambda b: (0, 0)),
            pl.BlockSpec((D, DK), lambda b: (0, 0)),
            pl.BlockSpec((D, DK), lambda b: (0, 0)),
            pl.BlockSpec((D, DV), lambda b: (0, 0)),
            pl.BlockSpec((DV, D), lambda b: (0, 0)),
            pl.BlockSpec((1, D), lambda b: (0, 0)),
            pl.BlockSpec((1, D), lambda b: (0, 0)),
            pl.BlockSpec((1, D), lambda b: (0, 0)),
            pl.BlockSpec((D, Hf), lambda b: (0, 0)),
            pl.BlockSpec((1, Hf), lambda b: (0, 0)),
            pl.BlockSpec((Hf, D), lambda b: (0, 0)),
            pl.BlockSpec((1, D), lambda b: (0, 0)),
        ],
        out_specs=pl.BlockSpec((1, N, D), lambda b: (b, 0, 0)),
        out_shape=jax.ShapeDtypeStruct((B, N, D), latent.dtype),
        compiler_params=pltpu.CompilerParams(
            dimension_semantics=("parallel",),
            vmem_limit_bytes=_VMEM_LIMIT),
    )(latent,
      p["sa_ln_g"].reshape(1, D), p["sa_ln_b"].reshape(1, D),
      p["sa"]["wq"], p["sa"]["wk"], p["sa"]["wv"],
      p["sa"]["wo"], p["sa"]["bo"].reshape(1, D),
      p["lf_ln_g"].reshape(1, D), p["lf_ln_b"].reshape(1, D),
      p["lf_w1"], p["lf_b1"].reshape(1, Hf), p["lf_w2"], p["lf_b2"].reshape(1, D))


def _classifier_kernel(x_ref, g_ref, b_ref, w_ref, wb_ref, o_ref):
    """Fused: Reduce('b n d -> b d', 'mean') -> LayerNorm -> Linear."""
    x = jnp.mean(x_ref[...].astype(jnp.float32), axis=1)          # (b, d)
    y = _ln(x, g_ref[...], b_ref[...]).astype(x_ref.dtype)
    o = (jnp.dot(y, w_ref[...], preferred_element_type=jnp.float32)
         + wb_ref[...].astype(jnp.float32))
    o_ref[...] = o.astype(o_ref.dtype)


def classifier(latent, g, b, w, wb):
    B, N, D = latent.shape
    n_classes = w.shape[1]
    return pl.pallas_call(
        _classifier_kernel,
        out_shape=jax.ShapeDtypeStruct((B, n_classes), latent.dtype),
        in_specs=[pl.BlockSpec(memory_space=VMEM)] * 5,
        out_specs=pl.BlockSpec(memory_space=VMEM),
    )(latent, g.reshape(1, D), b.reshape(1, D), w, wb.reshape(1, n_classes))


# ------------------------------ model glue ------------------------------------

def fourier_encode(axis_sizes, max_freq, n_bands, dtype=jnp.float32):
    """Standard Perceiver Fourier feature position encoding.
    Returns (*axis_sizes, in_axis * (2*n_bands + 1))."""
    axis_pos = [jnp.linspace(-1.0, 1.0, s, dtype=dtype) for s in axis_sizes]
    pos = jnp.stack(jnp.meshgrid(*axis_pos, indexing="ij"), axis=-1)  # (*axis, in_axis)
    x = pos[..., None]                                                # (*axis, in_axis, 1)
    freqs = jnp.linspace(1.0, max_freq / 2.0, n_bands, dtype=dtype)
    xf = x * freqs * math.pi                                          # (*axis, in_axis, n_bands)
    enc = jnp.concatenate([jnp.sin(xf), jnp.cos(xf), x], axis=-1)     # (..., 2*n_bands+1)
    return enc.reshape(tuple(axis_sizes) + (-1,))                     # '... n d -> ... (n d)'


def _cast_tree(tree, dtype):
    return jax.tree_util.tree_map(
        lambda a: a.astype(dtype) if jnp.issubdtype(a.dtype, jnp.floating) else a,
        tree)


def perceiver_layer(latent, kv_ctx, p, cfg, kv_tile):
    # cross attention + cross FFN (one fused pallas_call, flash-style KV streaming)
    latent = cross_attention_ffn(latent, kv_ctx, p,
                                 cfg["n_cross_head"], cfg["d_cross_head"],
                                 cfg["d_kv"], kv_tile)
    # latent self attention + latent FFN (one fused pallas_call)
    latent = self_attention_ffn(latent, p,
                                cfg["n_latent_head"], cfg["d_latent_head"],
                                cfg["d_kv"])
    return latent


def perceiver_forward(array, params, cfg, logits=True, compute_dtype=jnp.bfloat16):
    params = _cast_tree(params, compute_dtype)
    b = array.shape[0]
    axis = array.shape[1:-1]
    pos = fourier_encode(axis, cfg["max_freq"], cfg["n_bands"], jnp.float32)
    pos = jnp.broadcast_to(pos, (b,) + pos.shape)             # repeat '... -> b ...'
    x = jnp.concatenate([array.astype(jnp.float32), pos], axis=-1)  # cat along channel
    x = x.reshape(b, -1, x.shape[-1]).astype(compute_dtype)   # 'b ... d -> b (...) d'
    B, S, C = x.shape
    x2d = x.reshape(B * S, C)
    latent = jnp.broadcast_to(params["latent"], (b,) + params["latent"].shape)
    kv_tile = _kv_tile(S)

    def ctx_kv(layer_p):
        # packed [K | V] projection of the LayerNormed byte array (bf16)
        wkv = jnp.concatenate([layer_p["ca"]["wk"], layer_p["ca"]["wv"]], axis=1)
        kv = ln_kv_project(x2d, layer_p["ca_ln_c_g"], layer_p["ca_ln_c_b"], wkv)
        return kv.reshape(B, S, -1)

    if cfg["share_weights"]:
        layer_p = params["layers"][0]
        kv_ctx = ctx_kv(layer_p)          # hoisted: identical for every depth step
        for _ in range(cfg["depth"]):
            latent = perceiver_layer(latent, kv_ctx, layer_p, cfg, kv_tile)
    else:
        for d in range(cfg["depth"]):
            layer_p = params["layers"][d]
            kv_ctx = ctx_kv(layer_p)
            latent = perceiver_layer(latent, kv_ctx, layer_p, cfg, kv_tile)

    if logits:
        return classifier(latent, params["ln_g"], params["ln_b"],
                          params["w_cls"], params["b_cls"])
    return latent


# --------------------------- parameter init ------------------------------------

def _nrm(key, shape, scale=0.02):
    return scale * jax.random.normal(key, shape, dtype=jnp.float32)


def init_layer(key, cfg):
    d_lat, d_in = cfg["d_latent"], cfg["input_dim"]
    dc = cfg["n_cross_head"] * cfg["d_cross_head"]
    dcv = cfg["n_cross_head"] * cfg["d_kv"]
    dl = cfg["n_latent_head"] * cfg["d_latent_head"]
    dlv = cfg["n_latent_head"] * cfg["d_kv"]
    ks = iter(jax.random.split(key, 12))
    ones, zeros = jnp.ones, jnp.zeros
    return {
        "ca_ln_q_g": ones((d_lat,)), "ca_ln_q_b": zeros((d_lat,)),
        "ca_ln_c_g": ones((d_in,)), "ca_ln_c_b": zeros((d_in,)),
        "ca": {"wq": _nrm(next(ks), (d_lat, dc)), "wk": _nrm(next(ks), (d_in, dc)),
               "wv": _nrm(next(ks), (d_in, dcv)), "wo": _nrm(next(ks), (dcv, d_lat)),
               "bo": zeros((d_lat,))},
        "cf_ln_g": ones((d_lat,)), "cf_ln_b": zeros((d_lat,)),
        "cf_w1": _nrm(next(ks), (d_lat, 4 * d_lat)), "cf_b1": zeros((4 * d_lat,)),
        "cf_w2": _nrm(next(ks), (4 * d_lat, d_lat)), "cf_b2": zeros((d_lat,)),
        "sa_ln_g": ones((d_lat,)), "sa_ln_b": zeros((d_lat,)),
        "sa": {"wq": _nrm(next(ks), (d_lat, dl)), "wk": _nrm(next(ks), (d_lat, dl)),
               "wv": _nrm(next(ks), (d_lat, dlv)), "wo": _nrm(next(ks), (dlv, d_lat)),
               "bo": zeros((d_lat,))},
        "lf_ln_g": ones((d_lat,)), "lf_ln_b": zeros((d_lat,)),
        "lf_w1": _nrm(next(ks), (d_lat, 4 * d_lat)), "lf_b1": zeros((4 * d_lat,)),
        "lf_w2": _nrm(next(ks), (4 * d_lat, d_lat)), "lf_b2": zeros((d_lat,)),
    }


def init_params(key, cfg):
    n_layers = 1 if cfg["share_weights"] else cfg["depth"]
    keys = jax.random.split(key, n_layers + 2)
    return {
        "latent": jax.random.normal(keys[0], (cfg["n_latent"], cfg["d_latent"]),
                                    dtype=jnp.float32),
        "layers": [init_layer(keys[1 + i], cfg) for i in range(n_layers)],
        "ln_g": jnp.ones((cfg["d_latent"],)), "ln_b": jnp.zeros((cfg["d_latent"],)),
        "w_cls": _nrm(keys[-1], (cfg["d_latent"], cfg["n_classes"])),
        "b_cls": jnp.zeros((cfg["n_classes"],)),
    }


# ------------------------------- main ------------------------------------------

if __name__ == "__main__":
    cfg = dict(
        share_weights=False, depth=2, n_classes=10, in_axis=2, in_channel=4,
        max_freq=10.0, n_cross_head=2, n_latent_head=2, d_cross_head=16,
        d_latent_head=16, d_byte_arr=64, d_latent=32, n_latent=8, d_kv=16,
        n_bands=4,
    )
    cfg["input_dim"] = cfg["in_axis"] * (cfg["n_bands"] * 2 + 1) + cfg["in_channel"]

    key = jax.random.PRNGKey(0)
    k_in, k_par = jax.random.split(key)
    array = jax.random.normal(k_in, (2, 8, 8, cfg["in_channel"]), dtype=jnp.float32)
    params = init_params(k_par, cfg)

    fwd = jax.jit(functools.partial(perceiver_forward, cfg=cfg))
    out = fwd(array, params)
    out = jax.block_until_ready(out)

    assert out.shape == (2, cfg["n_classes"]), out.shape
    assert jnp.all(jnp.isfinite(out.astype(jnp.float32)))
    print("KERNEL_OK")
</pallas_src>

<mosaic_0001>
module attributes {stable_mosaic.version = 11 : i64} {
  func.func @_ln_kv_kernel(%arg0: i32, %arg1: memref<64x22xbf16, #tpu.memory_space<vmem>>, %arg2: memref<1x22xbf16, #tpu.memory_space<vmem>>, %arg3: memref<1x22xbf16, #tpu.memory_space<vmem>>, %arg4: memref<22x64xbf16, #tpu.memory_space<vmem>>, %arg5: memref<64x64xbf16, #tpu.memory_space<vmem>>) attributes {dimension_semantics = [#tpu.dimension_semantics<parallel>], iteration_bounds = array<i64: 2>, scalar_prefetch = 0 : i64, scratch_operands = 0 : i64, tpu.core_type = #tpu.core_type<tc>, window_params = [{transform_indices = @transform_0, window_bounds = array<i64: 64, 22>}, {pipeline_mode = #tpu.pipeline_mode<synchronous>, transform_indices = @transform_1, window_bounds = array<i64: 1, 22>}, {pipeline_mode = #tpu.pipeline_mode<synchronous>, transform_indices = @transform_2, window_bounds = array<i64: 1, 22>}, {pipeline_mode = #tpu.pipeline_mode<synchronous>, transform_indices = @transform_3, window_bounds = array<i64: 22, 64>}, {transform_indices = @transform_4, window_bounds = array<i64: 64, 64>}]} {
    %c0 = arith.constant 0 : index
    %c0_0 = arith.constant 0 : index
    %0 = vector.load %arg1[%c0, %c0_0] : memref<64x22xbf16, #tpu.memory_space<vmem>>, vector<64x22xbf16>
    %c0_1 = arith.constant 0 : index
    %c0_2 = arith.constant 0 : index
    %1 = vector.load %arg2[%c0_1, %c0_2] : memref<1x22xbf16, #tpu.memory_space<vmem>>, vector<1x22xbf16>
    %c0_3 = arith.constant 0 : index
    %c0_4 = arith.constant 0 : index
    %2 = vector.load %arg3[%c0_3, %c0_4] : memref<1x22xbf16, #tpu.memory_space<vmem>>, vector<1x22xbf16>
    %3 = arith.extf %0 : vector<64x22xbf16> to vector<64x22xf32>
    %cst = arith.constant dense<0.000000e+00> : vector<64xf32>
    %4 = vector.multi_reduction <add>, %3, %cst [1] : vector<64x22xf32> to vector<64xf32>
    %5 = vector.shape_cast %4 : vector<64xf32> to vector<64x1xf32>
    %cst_5 = arith.constant 2.200000e+01 : f32
    %6 = vector.broadcast %cst_5 : f32 to vector<64x1xf32>
    %7 = arith.divf %5, %6 : vector<64x1xf32>
    %8 = vector.broadcast %7 : vector<64x1xf32> to vector<64x22xf32>
    %9 = arith.subf %3, %8 : vector<64x22xf32>
    %10 = arith.mulf %9, %9 : vector<64x22xf32>
    %cst_6 = arith.constant dense<0.000000e+00> : vector<64xf32>
    %11 = vector.multi_reduction <add>, %10, %cst_6 [1] : vector<64x22xf32> to vector<64xf32>
    %12 = vector.shape_cast %11 : vector<64xf32> to vector<64x1xf32>
    %cst_7 = arith.constant 2.200000e+01 : f32
    %13 = vector.broadcast %cst_7 : f32 to vector<64x1xf32>
    %14 = arith.divf %12, %13 : vector<64x1xf32>
    %15 = vector.broadcast %7 : vector<64x1xf32> to vector<64x22xf32>
    %16 = arith.subf %3, %15 : vector<64x22xf32>
    %cst_8 = arith.constant 9.99999974E-6 : f32
    %17 = vector.broadcast %cst_8 : f32 to vector<64x1xf32>
    %18 = arith.addf %14, %17 : vector<64x1xf32>
    %19 = math.rsqrt %18 : vector<64x1xf32>
    %20 = vector.broadcast %19 : vector<64x1xf32> to vector<64x22xf32>
    %21 = arith.mulf %16, %20 : vector<64x22xf32>
    %22 = arith.extf %1 : vector<1x22xbf16> to vector<1x22xf32>
    %23 = vector.broadcast %22 : vector<1x22xf32> to vector<64x22xf32>
    %24 = arith.mulf %21, %23 : vector<64x22xf32>
    %25 = arith.extf %2 : vector<1x22xbf16> to vector<1x22xf32>
    %26 = vector.broadcast %25 : vector<1x22xf32> to vector<64x22xf32>
    %27 = arith.addf %24, %26 : vector<64x22xf32>
    %28 = arith.truncf %27 : vector<64x22xf32> to vector<64x22xbf16>
    %c0_9 = arith.constant 0 : index
    %c0_10 = arith.constant 0 : index
    %29 = vector.load %arg4[%c0_9, %c0_10] : memref<22x64xbf16, #tpu.memory_space<vmem>>, vector<22x64xbf16>
    %cst_11 = arith.constant dense<0.000000e+00> : vector<64x64xf32>
    %30 = tpu.matmul %28, %29, %cst_11 {dimension_numbers = #tpu.dot_dimension_numbers<[1], [0], [0], [1], [0, 0, 1, 1], [], []>} : vector<64x22xbf16>, vector<22x64xbf16>, vector<64x64xf32> -> vector<64x64xf32>
    %31 = arith.truncf %30 : vector<64x64xf32> to vector<64x64xbf16>
    %c0_12 = arith.constant 0 : index
    %c0_13 = arith.constant 0 : index
    %32 = vector.load %arg5[%c0_12, %c0_13] : memref<64x64xbf16, #tpu.memory_space<vmem>>, vector<64x64xbf16>
    tpu.vector_store %arg5[%c0_12, %c0_13], %31 {strides = array<i32>} : memref<64x64xbf16, #tpu.memory_space<vmem>>, vector<64x64xbf16>,
    return
  }
  func.func @transform_0(%arg0: i32) -> (i32, i32) {
    %c0_i32 = arith.constant 0 : i32
    %c0_i32_0 = arith.constant 0 : i32
    return %arg0, %c0_i32 : i32, i32
  }
  func.func @transform_1(%arg0: i32) -> (i32, i32) {
    %c0_i32 = arith.constant 0 : i32
    %c0_i32_0 = arith.constant 0 : i32
    %c0_i32_1 = arith.constant 0 : i32
    return %c0_i32, %c0_i32_0 : i32, i32
  }
  func.func @transform_2(%arg0: i32) -> (i32, i32) {
    %c0_i32 = arith.constant 0 : i32
    %c0_i32_0 = arith.constant 0 : i32
    %c0_i32_1 = arith.constant 0 : i32
    return %c0_i32, %c0_i32_0 : i32, i32
  }
  func.func @transform_3(%arg0: i32) -> (i32, i32) {
    %c0_i32 = arith.constant 0 : i32
    %c0_i32_0 = arith.constant 0 : i32
    %c0_i32_1 = arith.constant 0 : i32
    return %c0_i32, %c0_i32_0 : i32, i32
  }
  func.func @transform_4(%arg0: i32) -> (i32, i32) {
    %c0_i32 = arith.constant 0 : i32
    %c0_i32_0 = arith.constant 0 : i32
    return %arg0, %c0_i32 : i32, i32
  }
}

module attributes {stable_mosaic.version = 11 : i64} {
  func.func @_self_attn_ffn_kernel(%arg0: i32, %arg1: memref<1x8x32xbf16, #tpu.memory_space<vmem>>, %arg2: memref<1x32xbf16, #tpu.memory_space<vmem>>, %arg3: memref<1x32xbf16, #tpu.memory_space<vmem>>, %arg4: memref<32x32xbf16, #tpu.memory_space<vmem>>, %arg5: memref<32x32xbf16, #tpu.memory_space<vmem>>, %arg6: memref<32x32xbf16, #tpu.memory_space<vmem>>, %arg7: memref<32x32xbf16, #tpu.memory_space<vmem>>, %arg8: memref<1x32xbf16, #tpu.memory_space<vmem>>, %arg9: memref<1x32xbf16, #tpu.memory_space<vmem>>, %arg10: memref<1x32xbf16, #tpu.memory_space<vmem>>, %arg11: memref<32x128xbf16, #tpu.memory_space<vmem>>, %arg12: memref<1x128xbf16, #tpu.memory_space<vmem>>, %arg13: memref<128x32xbf16, #tpu.memory_space<vmem>>, %arg14: memref<1x32xbf16, #tpu.memory_space<vmem>>, %arg15: memref<1x8x32xbf16, #tpu.memory_space<vmem>>) attributes {dimension_semantics = [#tpu.dimension_semantics<parallel>], iteration_bounds = array<i64: 2>, scalar_prefetch = 0 : i64, scratch_operands = 0 : i64, tpu.core_type = #tpu.core_type<tc>, window_params = [{transform_indices = @transform_0, window_bounds = array<i64: 1, 8, 32>}, {pipeline_mode = #tpu.pipeline_mode<synchronous>, transform_indices = @transform_1, window_bounds = array<i64: 1, 32>}, {pipeline_mode = #tpu.pipeline_mode<synchronous>, transform_indices = @transform_2, window_bounds = array<i64: 1, 32>}, {pipeline_mode = #tpu.pipeline_mode<synchronous>, transform_indices = @transform_3, window_bounds = array<i64: 32, 32>}, {pipeline_mode = #tpu.pipeline_mode<synchronous>, transform_indices = @transform_4, window_bounds = array<i64: 32, 32>}, {pipeline_mode = #tpu.pipeline_mode<synchronous>, transform_indices = @transform_5, window_bounds = array<i64: 32, 32>}, {pipeline_mode = #tpu.pipeline_mode<synchronous>, transform_indices = @transform_6, window_bounds = array<i64: 32, 32>}, {pipeline_mode = #tpu.pipeline_mode<synchronous>, transform_indices = @transform_7, window_bounds = array<i64: 1, 32>}, {pipeline_mode = #tpu.pipeline_mode<synchronous>, transform_indices = @transform_8, window_bounds = array<i64: 1, 32>}, {pipeline_mode = #tpu.pipeline_mode<synchronous>, transform_indices = @transform_9, window_bounds = array<i64: 1, 32>}, {pipeline_mode = #tpu.pipeline_mode<synchronous>, transform_indices = @transform_10, window_bounds = array<i64: 32, 128>}, {pipeline_mode = #tpu.pipeline_mode<synchronous>, transform_indices = @transform_11, window_bounds = array<i64: 1, 128>}, {pipeline_mode = #tpu.pipeline_mode<synchronous>, transform_indices = @transform_12, window_bounds = array<i64: 128, 32>}, {pipeline_mode = #tpu.pipeline_mode<synchronous>, transform_indices = @transform_13, window_bounds = array<i64: 1, 32>}, {transform_indices = @transform_14, window_bounds = array<i64: 1, 8, 32>}]} {
    %c0 = arith.constant 0 : index
    %c0_0 = arith.constant 0 : index
    %c0_1 = arith.constant 0 : index
    %0 = vector.load %arg1[%c0, %c0_0, %c0_1] : memref<1x8x32xbf16, #tpu.memory_space<vmem>>, vector<1x8x32xbf16>
    %1 = vector.shape_cast %0 : vector<1x8x32xbf16> to vector<8x32xbf16>
    %c0_2 = arith.constant 0 : index
    %c0_3 = arith.constant 0 : index
    %2 = vector.load %arg2[%c0_2, %c0_3] : memref<1x32xbf16, #tpu.memory_space<vmem>>, vector<1x32xbf16>
    %c0_4 = arith.constant 0 : index
    %c0_5 = arith.constant 0 : index
    %3 = vector.load %arg3[%c0_4, %c0_5] : memref<1x32xbf16, #tpu.memory_space<vmem>>, vector<1x32xbf16>
    %4 = arith.extf %1 : vector<8x32xbf16> to vector<8x32xf32>
    %cst = arith.constant dense<0.000000e+00> : vector<8xf32>
    %5 = vector.multi_reduction <add>, %4, %cst [1] : vector<8x32xf32> to vector<8xf32>
    %6 = vector.shape_cast %5 : vector<8xf32> to vector<8x1xf32>
    %cst_6 = arith.constant 3.200000e+01 : f32
    %7 = vector.broadcast %cst_6 : f32 to vector<8x1xf32>
    %8 = arith.divf %6, %7 : vector<8x1xf32>
    %9 = vector.broadcast %8 : vector<8x1xf32> to vector<8x32xf32>
    %10 = arith.subf %4, %9 : vector<8x32xf32>
    %11 = arith.mulf %10, %10 : vector<8x32xf32>
    %cst_7 = arith.constant dense<0.000000e+00> : vector<8xf32>
    %12 = vector.multi_reduction <add>, %11, %cst_7 [1] : vector<8x32xf32> to vector<8xf32>
    %13 = vector.shape_cast %12 : vector<8xf32> to vector<8x1xf32>
    %cst_8 = arith.constant 3.200000e+01 : f32
    %14 = vector.broadcast %cst_8 : f32 to vector<8x1xf32>
    %15 = arith.divf %13, %14 : vector<8x1xf32>
    %16 = vector.broadcast %8 : vector<8x1xf32> to vector<8x32xf32>
    %17 = arith.subf %4, %16 : vector<8x32xf32>
    %cst_9 = arith.constant 9.99999974E-6 : f32
    %18 = vector.broadcast %cst_9 : f32 to vector<8x1xf32>
    %19 = arith.addf %15, %18 : vector<8x1xf32>
    %20 = math.rsqrt %19 : vector<8x1xf32>
    %21 = vector.broadcast %20 : vector<8x1xf32> to vector<8x32xf32>
    %22 = arith.mulf %17, %21 : vector<8x32xf32>
    %23 = arith.extf %2 : vector<1x32xbf16> to vector<1x32xf32>
    %24 = vector.broadcast %23 : vector<1x32xf32> to vector<8x32xf32>
    %25 = arith.mulf %22, %24 : vector<8x32xf32>
    %26 = arith.extf %3 : vector<1x32xbf16> to vector<1x32xf32>
    %27 = vector.broadcast %26 : vector<1x32xf32> to vector<8x32xf32>
    %28 = arith.addf %25, %27 : vector<8x32xf32>
    %29 = arith.truncf %28 : vector<8x32xf32> to vector<8x32xbf16>
    %c0_10 = arith.constant 0 : index
    %c0_11 = arith.constant 0 : index
    %30 = vector.load %arg4[%c0_10, %c0_11] : memref<32x32xbf16, #tpu.memory_space<vmem>>, vector<32x32xbf16>
    %cst_12 = arith.constant dense<0.000000e+00> : vector<8x32xf32>
    %31 = tpu.matmul %29, %30, %cst_12 {dimension_numbers = #tpu.dot_dimension_numbers<[1], [0], [0], [1], [0, 0, 1, 1], [], []>} : vector<8x32xbf16>, vector<32x32xbf16>, vector<8x32xf32> -> vector<8x32xf32>
    %cst_13 = arith.constant 2.500000e-01 : f32
    %32 = vector.broadcast %cst_13 : f32 to vector<8x32xf32>
    %33 = arith.mulf %31, %32 : vector<8x32xf32>
    %34 = arith.truncf %33 : vector<8x32xf32> to vector<8x32xbf16>
    %c0_14 = arith.constant 0 : index
    %c0_15 = arith.constant 0 : index
    %35 = vector.load %arg5[%c0_14, %c0_15] : memref<32x32xbf16, #tpu.memory_space<vmem>>, vector<32x32xbf16>
    %cst_16 = arith.constant dense<0.000000e+00> : vector<8x32xf32>
    %36 = tpu.matmul %29, %35, %cst_16 {dimension_numbers = #tpu.dot_dimension_numbers<[1], [0], [0], [1], [0, 0, 1, 1], [], []>} : vector<8x32xbf16>, vector<32x32xbf16>, vector<8x32xf32> -> vector<8x32xf32>
    %37 = arith.truncf %36 : vector<8x32xf32> to vector<8x32xbf16>
    %c0_17 = arith.constant 0 : index
    %c0_18 = arith.constant 0 : index
    %38 = vector.load %arg6[%c0_17, %c0_18] : memref<32x32xbf16, #tpu.memory_space<vmem>>, vector<32x32xbf16>
    %cst_19 = arith.constant dense<0.000000e+00> : vector<8x32xf32>
    %39 = tpu.matmul %29, %38, %cst_19 {dimension_numbers = #tpu.dot_dimension_numbers<[1], [0], [0], [1], [0, 0, 1, 1], [], []>} : vector<8x32xbf16>, vector<32x32xbf16>, vector<8x32xf32> -> vector<8x32xf32>
    %40 = arith.truncf %39 : vector<8x32xf32> to vector<8x32xbf16>
    %c0_20 = arith.constant 0 : index
    %c0_21 = arith.constant 0 : index
    %41 = vector.load %arg7[%c0_20, %c0_21] : memref<32x32xbf16, #tpu.memory_space<vmem>>, vector<32x32xbf16>
    %cst_22 = arith.constant 0.000000e+00 : f32
    %42 = vector.broadcast %cst_22 : f32 to vector<8x32xf32>
    %43 = vector.extract_strided_slice %34 {offsets = [0, 0], sizes = [8, 16], strides = [1, 1]} : vector<8x32xbf16> to vector<8x16xbf16>
    %44 = vector.extract_strided_slice %37 {offsets = [0, 0], sizes = [8, 16], strides = [1, 1]} : vector<8x32xbf16> to vector<8x16xbf16>
    %45 = vector.extract_strided_slice %40 {offsets = [0, 0], sizes = [8, 16], strides = [1, 1]} : vector<8x32xbf16> to vector<8x16xbf16>
    %cst_23 = arith.constant dense<0.000000e+00> : vector<8x8xf32>
    %46 = tpu.matmul %43, %44, %cst_23 {dimension_numbers = #tpu.dot_dimension_numbers<[1], [1], [0], [0], [0, 0, 1, 0], [], []>} : vector<8x16xbf16>, vector<8x16xbf16>, vector<8x8xf32> -> vector<8x8xf32>
    %cst_24 = arith.constant dense<0xFF800000> : vector<8xf32>
    %47 = vector.multi_reduction <maximumf>, %46, %cst_24 [1] : vector<8x8xf32> to vector<8xf32>
    %48 = vector.shape_cast %47 : vector<8xf32> to vector<8x1xf32>
    %49 = vector.broadcast %48 : vector<8x1xf32> to vector<8x8xf32>
    %50 = arith.subf %46, %49 : vector<8x8xf32>
    %51 = math.exp %50 : vector<8x8xf32>
    %cst_25 = arith.constant dense<0.000000e+00> : vector<8xf32>
    %52 = vector.multi_reduction <add>, %51, %cst_25 [1] : vector<8x8xf32> to vector<8xf32>
    %53 = vector.shape_cast %52 : vector<8xf32> to vector<8x1xf32>
    %54 = arith.truncf %51 : vector<8x8xf32> to vector<8x8xbf16>
    %cst_26 = arith.constant dense<0.000000e+00> : vector<8x16xf32>
    %55 = tpu.matmul %54, %45, %cst_26 {dimension_numbers = #tpu.dot_dimension_numbers<[1], [0], [0], [1], [0, 0, 1, 1], [], []>} : vector<8x8xbf16>, vector<8x16xbf16>, vector<8x16xf32> -> vector<8x16xf32>
    %56 = tpu.reciprocal %53 {approx = true} : vector<8x1xf32> -> vector<8x1xf32>
    %57 = vector.broadcast %56 : vector<8x1xf32> to vector<8x16xf32>
    %58 = arith.mulf %55, %57 : vector<8x16xf32>
    %59 = arith.truncf %58 : vector<8x16xf32> to vector<8x16xbf16>
    %60 = vector.extract_strided_slice %41 {offsets = [0, 0], sizes = [16, 32], strides = [1, 1]} : vector<32x32xbf16> to vector<16x32xbf16>
    %cst_27 = arith.constant dense<0.000000e+00> : vector<8x32xf32>
    %61 = tpu.matmul %59, %60, %cst_27 {dimension_numbers = #tpu.dot_dimension_numbers<[1], [0], [0], [1], [0, 0, 1, 1], [], []>} : vector<8x16xbf16>, vector<16x32xbf16>, vector<8x32xf32> -> vector<8x32xf32>
    %62 = arith.addf %42, %61 : vector<8x32xf32>
    %63 = vector.extract_strided_slice %34 {offsets = [0, 16], sizes = [8, 16], strides = [1, 1]} : vector<8x32xbf16> to vector<8x16xbf16>
    %64 = vector.extract_strided_slice %37 {offsets = [0, 16], sizes = [8, 16], strides = [1, 1]} : vector<8x32xbf16> to vector<8x16xbf16>
    %65 = vector.extract_strided_slice %40 {offsets = [0, 16], sizes = [8, 16], strides = [1, 1]} : vector<8x32xbf16> to vector<8x16xbf16>
    %cst_28 = arith.constant dense<0.000000e+00> : vector<8x8xf32>
    %66 = tpu.matmul %63, %64, %cst_28 {dimension_numbers = #tpu.dot_dimension_numbers<[1], [1], [0], [0], [0, 0, 1, 0], [], []>} : vector<8x16xbf16>, vector<8x16xbf16>, vector<8x8xf32> -> vector<8x8xf32>
    %cst_29 = arith.constant dense<0xFF800000> : vector<8xf32>
    %67 = vector.multi_reduction <maximumf>, %66, %cst_29 [1] : vector<8x8xf32> to vector<8xf32>
    %68 = vector.shape_cast %67 : vector<8xf32> to vector<8x1xf32>
    %69 = vector.broadcast %68 : vector<8x1xf32> to vector<8x8xf32>
    %70 = arith.subf %66, %69 : vector<8x8xf32>
    %71 = math.exp %70 : vector<8x8xf32>
    %cst_30 = arith.constant dense<0.000000e+00> : vector<8xf32>
    %72 = vector.multi_reduction <add>, %71, %cst_30 [1] : vector<8x8xf32> to vector<8xf32>
    %73 = vector.shape_cast %72 : vector<8xf32> to vector<8x1xf32>
    %74 = arith.truncf %71 : vector<8x8xf32> to vector<8x8xbf16>
    %cst_31 = arith.constant dense<0.000000e+00> : vector<8x16xf32>
    %75 = tpu.matmul %74, %65, %cst_31 {dimension_numbers = #tpu.dot_dimension_numbers<[1], [0], [0], [1], [0, 0, 1, 1], [], []>} : vector<8x8xbf16>, vector<8x16xbf16>, vector<8x16xf32> -> vector<8x16xf32>
    %76 = tpu.reciprocal %73 {approx = true} : vector<8x1xf32> -> vector<8x1xf32>
    %77 = vector.broadcast %76 : vector<8x1xf32> to vector<8x16xf32>
    %78 = arith.mulf %75, %77 : vector<8x16xf32>
    %79 = arith.truncf %78 : vector<8x16xf32> to vector<8x16xbf16>
    %80 = vector.extract_strided_slice %41 {offsets = [16, 0], sizes = [16, 32], strides = [1, 1]} : vector<32x32xbf16> to vector<16x32xbf16>
    %cst_32 = arith.constant dense<0.000000e+00> : vector<8x32xf32>
    %81 = tpu.matmul %79, %80, %cst_32 {dimension_numbers = #tpu.dot_dimension_numbers<[1], [0], [0], [1], [0, 0, 1, 1], [], []>} : vector<8x16xbf16>, vector<16x32xbf16>, vector<8x32xf32> -> vector<8x32xf32>
    %82 = arith.addf %62, %81 : vector<8x32xf32>
    %83 = arith.extf %1 : vector<8x32xbf16> to vector<8x32xf32>
    %84 = arith.addf %83, %82 : vector<8x32xf32>
    %c0_33 = arith.constant 0 : index
    %c0_34 = arith.constant 0 : index
    %85 = vector.load %arg8[%c0_33, %c0_34] : memref<1x32xbf16, #tpu.memory_space<vmem>>, vector<1x32xbf16>
    %86 = arith.extf %85 : vector<1x32xbf16> to vector<1x32xf32>
    %87 = vector.broadcast %86 : vector<1x32xf32> to vector<8x32xf32>
    %88 = arith.addf %84, %87 : vector<8x32xf32>
    %c0_35 = arith.constant 0 : index
    %c0_36 = arith.constant 0 : index
    %89 = vector.load %arg9[%c0_35, %c0_36] : memref<1x32xbf16, #tpu.memory_space<vmem>>, vector<1x32xbf16>
    %c0_37 = arith.constant 0 : index
    %c0_38 = arith.constant 0 : index
    %90 = vector.load %arg10[%c0_37, %c0_38] : memref<1x32xbf16, #tpu.memory_space<vmem>>, vector<1x32xbf16>
    %cst_39 = arith.constant dense<0.000000e+00> : vector<8xf32>
    %91 = vector.multi_reduction <add>, %88, %cst_39 [1] : vector<8x32xf32> to vector<8xf32>
    %92 = vector.shape_cast %91 : vector<8xf32> to vector<8x1xf32>
    %cst_40 = arith.constant 3.200000e+01 : f32
    %93 = vector.broadcast %cst_40 : f32 to vector<8x1xf32>
    %94 = arith.divf %92, %93 : vector<8x1xf32>
    %95 = vector.broadcast %94 : vector<8x1xf32> to vector<8x32xf32>
    %96 = arith.subf %88, %95 : vector<8x32xf32>
    %97 = arith.mulf %96, %96 : vector<8x32xf32>
    %cst_41 = arith.constant dense<0.000000e+00> : vector<8xf32>
    %98 = vector.multi_reduction <add>, %97, %cst_41 [1] : vector<8x32xf32> to vector<8xf32>
    %99 = vector.shape_cast %98 : vector<8xf32> to vector<8x1xf32>
    %cst_42 = arith.constant 3.200000e+01 : f32
    %100 = vector.broadcast %cst_42 : f32 to vector<8x1xf32>
    %101 = arith.divf %99, %100 : vector<8x1xf32>
    %102 = vector.broadcast %94 : vector<8x1xf32> to vector<8x32xf32>
    %103 = arith.subf %88, %102 : vector<8x32xf32>
    %cst_43 = arith.constant 9.99999974E-6 : f32
    %104 = vector.broadcast %cst_43 : f32 to vector<8x1xf32>
    %105 = arith.addf %101, %104 : vector<8x1xf32>
    %106 = math.rsqrt %105 : vector<8x1xf32>
    %107 = vector.broadcast %106 : vector<8x1xf32> to vector<8x32xf32>
    %108 = arith.mulf %103, %107 : vector<8x32xf32>
    %109 = arith.extf %89 : vector<1x32xbf16> to vector<1x32xf32>
    %110 = vector.broadcast %109 : vector<1x32xf32> to vector<8x32xf32>
    %111 = arith.mulf %108, %110 : vector<8x32xf32>
    %112 = arith.extf %90 : vector<1x32xbf16> to vector<1x32xf32>
    %113 = vector.broadcast %112 : vector<1x32xf32> to vector<8x32xf32>
    %114 = arith.addf %111, %113 : vector<8x32xf32>
    %115 = arith.truncf %114 : vector<8x32xf32> to vector<8x32xbf16>
    %c0_44 = arith.constant 0 : index
    %c0_45 = arith.constant 0 : index
    %116 = vector.load %arg11[%c0_44, %c0_45] : memref<32x128xbf16, #tpu.memory_space<vmem>>, vector<32x128xbf16>
    %cst_46 = arith.constant dense<0.000000e+00> : vector<8x128xf32>
    %117 = tpu.matmul %115, %116, %cst_46 {dimension_numbers = #tpu.dot_dimension_numbers<[1], [0], [0], [1], [0, 0, 1, 1], [], []>} : vector<8x32xbf16>, vector<32x128xbf16>, vector<8x128xf32> -> vector<8x128xf32>
    %c0_47 = arith.constant 0 : index
    %c0_48 = arith.constant 0 : index
    %118 = vector.load %arg12[%c0_47, %c0_48] : memref<1x128xbf16, #tpu.memory_space<vmem>>, vector<1x128xbf16>
    %119 = arith.extf %118 : vector<1x128xbf16> to vector<1x128xf32>
    %120 = vector.broadcast %119 : vector<1x128xf32> to vector<8x128xf32>
    %121 = arith.addf %117, %120 : vector<8x128xf32>
    %122 = arith.mulf %121, %121 : vector<8x128xf32>
    %123 = arith.mulf %121, %122 : vector<8x128xf32>
    %cst_49 = arith.constant 4.471500e-02 : f32
    %124 = vector.broadcast %cst_49 : f32 to vector<8x128xf32>
    %125 = arith.mulf %124, %123 : vector<8x128xf32>
    %126 = arith.addf %121, %125 : vector<8x128xf32>
    %cst_50 = arith.constant 0.797884583 : f32
    %127 = vector.broadcast %cst_50 : f32 to vector<8x128xf32>
    %128 = arith.mulf %127, %126 : vector<8x128xf32>
    %129 = math.tanh %128 : vector<8x128xf32>
    %cst_51 = arith.constant 1.000000e+00 : f32
    %130 = vector.broadcast %cst_51 : f32 to vector<8x128xf32>
    %131 = arith.addf %130, %129 : vector<8x128xf32>
    %cst_52 = arith.constant 5.000000e-01 : f32
    %132 = vector.broadcast %cst_52 : f32 to vector<8x128xf32>
    %133 = arith.mulf %132, %131 : vector<8x128xf32>
    %134 = arith.mulf %121, %133 : vector<8x128xf32>
    %135 = arith.truncf %134 : vector<8x128xf32> to vector<8x128xbf16>
    %c0_53 = arith.constant 0 : index
    %c0_54 = arith.constant 0 : index
    %136 = vector.load %arg13[%c0_53, %c0_54] : memref<128x32xbf16, #tpu.memory_space<vmem>>, vector<128x32xbf16>
    %cst_55 = arith.constant dense<0.000000e+00> : vector<8x32xf32>
    %137 = tpu.matmul %135, %136, %cst_55 {dimension_numbers = #tpu.dot_dimension_numbers<[1], [0], [0], [1], [0, 0, 1, 1], [], []>} : vector<8x128xbf16>, vector<128x32xbf16>, vector<8x32xf32> -> vector<8x32xf32>
    %c0_56 = arith.constant 0 : index
    %c0_57 = arith.constant 0 : index
    %138 = vector.load %arg14[%c0_56, %c0_57] : memref<1x32xbf16, #tpu.memory_space<vmem>>, vector<1x32xbf16>
    %139 = arith.extf %138 : vector<1x32xbf16> to vector<1x32xf32>
    %140 = vector.broadcast %139 : vector<1x32xf32> to vector<8x32xf32>
    %141 = arith.addf %137, %140 : vector<8x32xf32>
    %142 = arith.addf %88, %141 : vector<8x32xf32>
    %143 = arith.truncf %142 : vector<8x32xf32> to vector<8x32xbf16>
    %c0_58 = arith.constant 0 : index
    %c0_59 = arith.constant 0 : index
    %c0_60 = arith.constant 0 : index
    %144 = vector.load %arg15[%c0_58, %c0_59, %c0_60] : memref<1x8x32xbf16, #tpu.memory_space<vmem>>, vector<1x8x32xbf16>
    %145 = vector.shape_cast %144 : vector<1x8x32xbf16> to vector<8x32xbf16>
    %146 = vector.shape_cast %143 : vector<8x32xbf16> to vector<1x8x32xbf16>
    tpu.vector_store %arg15[%c0_58, %c0_59, %c0_60], %146 {strides = array<i32>} : memref<1x8x32xbf16, #tpu.memory_space<vmem>>, vector<1x8x32xbf16>,
    return
  }
  func.func @transform_0(%arg0: i32) -> (i32, i32, i32) {
    %c0_i32 = arith.constant 0 : i32
    %c0_i32_0 = arith.constant 0 : i32
    %c0_i32_1 = arith.constant 0 : i32
    return %arg0, %c0_i32, %c0_i32_0 : i32, i32, i32
  }
  func.func @transform_1(%arg0: i32) -> (i32, i32) {
    %c0_i32 = arith.constant 0 : i32
    %c0_i32_0 = arith.constant 0 : i32
    %c0_i32_1 = arith.constant 0 : i32
    return %c0_i32, %c0_i32_0 : i32, i32
  }
  func.func @transform_2(%arg0: i32) -> (i32, i32) {
    %c0_i32 = arith.constant 0 : i32
    %c0_i32_0 = arith.constant 0 : i32
    %c0_i32_1 = arith.constant 0 : i32
    return %c0_i32, %c0_i32_0 : i32, i32
  }
  func.func @transform_3(%arg0: i32) -> (i32, i32) {
    %c0_i32 = arith.constant 0 : i32
    %c0_i32_0 = arith.constant 0 : i32
    %c0_i32_1 = arith.constant 0 : i32
    return %c0_i32, %c0_i32_0 : i32, i32
  }
  func.func @transform_4(%arg0: i32) -> (i32, i32) {
    %c0_i32 = arith.constant 0 : i32
    %c0_i32_0 = arith.constant 0 : i32
    %c0_i32_1 = arith.constant 0 : i32
    return %c0_i32, %c0_i32_0 : i32, i32
  }
  func.func @transform_5(%arg0: i32) -> (i32, i32) {
    %c0_i32 = arith.constant 0 : i32
    %c0_i32_0 = arith.constant 0 : i32
    %c0_i32_1 = arith.constant 0 : i32
    return %c0_i32, %c0_i32_0 : i32, i32
  }
  func.func @transform_6(%arg0: i32) -> (i32, i32) {
    %c0_i32 = arith.constant 0 : i32
    %c0_i32_0 = arith.constant 0 : i32
    %c0_i32_1 = arith.constant 0 : i32
    return %c0_i32, %c0_i32_0 : i32, i32
  }
  func.func @transform_7(%arg0: i32) -> (i32, i32) {
    %c0_i32 = arith.constant 0 : i32
    %c0_i32_0 = arith.constant 0 : i32
    %c0_i32_1 = arith.constant 0 : i32
    return %c0_i32, %c0_i32_0 : i32, i32
  }
  func.func @transform_8(%arg0: i32) -> (i32, i32) {
    %c0_i32 = arith.constant 0 : i32
    %c0_i32_0 = arith.constant 0 : i32
    %c0_i32_1 = arith.constant 0 : i32
    return %c0_i32, %c0_i32_0 : i32, i32
  }
  func.func @transform_9(%arg0: i32) -> (i32, i32) {
    %c0_i32 = arith.constant 0 : i32
    %c0_i32_0 = arith.constant 0 : i32
    %c0_i32_1 = arith.constant 0 : i32
    return %c0_i32, %c0_i32_0 : i32, i32
  }
  func.func @transform_10(%arg0: i32) -> (i32, i32) {
    %c0_i32 = arith.constant 0 : i32
    %c0_i32_0 = arith.constant 0 : i32
    %c0_i32_1 = arith.constant 0 : i32
    return %c0_i32, %c0_i32_0 : i32, i32
  }
  func.func @transform_11(%arg0: i32) -> (i32, i32) {
    %c0_i32 = arith.constant 0 : i32
    %c0_i32_0 = arith.constant 0 : i32
    %c0_i32_1 = arith.constant 0 : i32
    return %c0_i32, %c0_i32_0 : i32, i32
  }
  func.func @transform_12(%arg0: i32) -> (i32, i32) {
    %c0_i32 = arith.constant 0 : i32
    %c0_i32_0 = arith.constant 0 : i32
    %c0_i32_1 = arith.constant 0 : i32
    return %c0_i32, %c0_i32_0 : i32, i32
  }
  func.func @transform_13(%arg0: i32) -> (i32, i32) {
    %c0_i32 = arith.constant 0 : i32
    %c0_i32_0 = arith.constant 0 : i32
    %c0_i32_1 = arith.constant 0 : i32
    return %c0_i32, %c0_i32_0 : i32, i32
  }
  func.func @transform_14(%arg0: i32) -> (i32, i32, i32) {
    %c0_i32 = arith.constant 0 : i32
    %c0_i32_0 = arith.constant 0 : i32
    %c0_i32_1 = arith.constant 0 : i32
    return %arg0, %c0_i32, %c0_i32_0 : i32, i32, i32
  }
}

module attributes {stable_mosaic.version = 11 : i64} {
  func.func @_cross_attn_ffn_kernel(%arg0: i32, %arg1: i32, %arg2: memref<1x8x32xbf16, #tpu.memory_space<vmem>>, %arg3: memref<1x64x64xbf16, #tpu.memory_space<vmem>>, %arg4: memref<1x32xbf16, #tpu.memory_space<vmem>>, %arg5: memref<1x32xbf16, #tpu.memory_space<vmem>>, %arg6: memref<32x32xbf16, #tpu.memory_space<vmem>>, %arg7: memref<32x32xbf16, #tpu.memory_space<vmem>>, %arg8: memref<1x32xbf16, #tpu.memory_space<vmem>>, %arg9: memref<1x32xbf16, #tpu.memory_space<vmem>>, %arg10: memref<1x32xbf16, #tpu.memory_space<vmem>>, %arg11: memref<32x128xbf16, #tpu.memory_space<vmem>>, %arg12: memref<1x128xbf16, #tpu.memory_space<vmem>>, %arg13: memref<128x32xbf16, #tpu.memory_space<vmem>>, %arg14: memref<1x32xbf16, #tpu.memory_space<vmem>>, %arg15: memref<1x8x32xbf16, #tpu.memory_space<vmem>>, %arg16: memref<8x32xf32, #tpu.memory_space<vmem>>, %arg17: memref<2x8x1xf32, #tpu.memory_space<vmem>>, %arg18: memref<2x8x1xf32, #tpu.memory_space<vmem>>, %arg19: memref<2x8x16xf32, #tpu.memory_space<vmem>>) attributes {dimension_semantics = [#tpu.dimension_semantics<parallel>, #tpu.dimension_semantics<arbitrary>], iteration_bounds = array<i64: 2, 1>, scalar_prefetch = 0 : i64, scratch_operands = 4 : i64, tpu.core_type = #tpu.core_type<tc>, window_params = [{transform_indices = @transform_0, window_bounds = array<i64: 1, 8, 32>}, {transform_indices = @transform_1, window_bounds = array<i64: 1, 64, 64>}, {pipeline_mode = #tpu.pipeline_mode<synchronous>, transform_indices = @transform_2, window_bounds = array<i64: 1, 32>}, {pipeline_mode = #tpu.pipeline_mode<synchronous>, transform_indices = @transform_3, window_bounds = array<i64: 1, 32>}, {pipeline_mode = #tpu.pipeline_mode<synchronous>, transform_indices = @transform_4, window_bounds = array<i64: 32, 32>}, {pipeline_mode = #tpu.pipeline_mode<synchronous>, transform_indices = @transform_5, window_bounds = array<i64: 32, 32>}, {pipeline_mode = #tpu.pipeline_mode<synchronous>, transform_indices = @transform_6, window_bounds = array<i64: 1, 32>}, {pipeline_mode = #tpu.pipeline_mode<synchronous>, transform_indices = @transform_7, window_bounds = array<i64: 1, 32>}, {pipeline_mode = #tpu.pipeline_mode<synchronous>, transform_indices = @transform_8, window_bounds = array<i64: 1, 32>}, {pipeline_mode = #tpu.pipeline_mode<synchronous>, transform_indices = @transform_9, window_bounds = array<i64: 32, 128>}, {pipeline_mode = #tpu.pipeline_mode<synchronous>, transform_indices = @transform_10, window_bounds = array<i64: 1, 128>}, {pipeline_mode = #tpu.pipeline_mode<synchronous>, transform_indices = @transform_11, window_bounds = array<i64: 128, 32>}, {pipeline_mode = #tpu.pipeline_mode<synchronous>, transform_indices = @transform_12, window_bounds = array<i64: 1, 32>}, {transform_indices = @transform_13, window_bounds = array<i64: 1, 8, 32>}]} {
    %c0 = arith.constant 0 : index
    %c0_0 = arith.constant 0 : index
    %c0_1 = arith.constant 0 : index
    %0 = vector.load %arg2[%c0, %c0_0, %c0_1] : memref<1x8x32xbf16, #tpu.memory_space<vmem>>, vector<1x8x32xbf16>
    %1 = vector.shape_cast %0 : vector<1x8x32xbf16> to vector<8x32xbf16>
    %c0_i32 = arith.constant 0 : i32
    %2 = arith.cmpi eq, %arg1, %c0_i32 : i32
    %3 = arith.extui %2 : i1 to i32
    %c0_i32_2 = arith.constant 0 : i32
    %4 = arith.cmpi ne, %3, %c0_i32_2 : i32
    scf.if %4 {
      %c0_52 = arith.constant 0 : index
      %c0_53 = arith.constant 0 : index
      %84 = vector.load %arg4[%c0_52, %c0_53] : memref<1x32xbf16, #tpu.memory_space<vmem>>, vector<1x32xbf16>
      %c0_54 = arith.constant 0 : index
      %c0_55 = arith.constant 0 : index
      %85 = vector.load %arg5[%c0_54, %c0_55] : memref<1x32xbf16, #tpu.memory_space<vmem>>, vector<1x32xbf16>
      %86 = arith.extf %1 : vector<8x32xbf16> to vector<8x32xf32>
      %cst_56 = arith.constant dense<0.000000e+00> : vector<8xf32>
      %87 = vector.multi_reduction <add>, %86, %cst_56 [1] : vector<8x32xf32> to vector<8xf32>
      %88 = vector.shape_cast %87 : vector<8xf32> to vector<8x1xf32>
      %cst_57 = arith.constant 3.200000e+01 : f32
      %89 = vector.broadcast %cst_57 : f32 to vector<8x1xf32>
      %90 = arith.divf %88, %89 : vector<8x1xf32>
      %91 = vector.broadcast %90 : vector<8x1xf32> to vector<8x32xf32>
      %92 = arith.subf %86, %91 : vector<8x32xf32>
      %93 = arith.mulf %92, %92 : vector<8x32xf32>
      %cst_58 = arith.constant dense<0.000000e+00> : vector<8xf32>
      %94 = vector.multi_reduction <add>, %93, %cst_58 [1] : vector<8x32xf32> to vector<8xf32>
      %95 = vector.shape_cast %94 : vector<8xf32> to vector<8x1xf32>
      %cst_59 = arith.constant 3.200000e+01 : f32
      %96 = vector.broadcast %cst_59 : f32 to vector<8x1xf32>
      %97 = arith.divf %95, %96 : vector<8x1xf32>
      %98 = vector.broadcast %90 : vector<8x1xf32> to vector<8x32xf32>
      %99 = arith.subf %86, %98 : vector<8x32xf32>
      %cst_60 = arith.constant 9.99999974E-6 : f32
      %100 = vector.broadcast %cst_60 : f32 to vector<8x1xf32>
      %101 = arith.addf %97, %100 : vector<8x1xf32>
      %102 = math.rsqrt %101 : vector<8x1xf32>
      %103 = vector.broadcast %102 : vector<8x1xf32> to vector<8x32xf32>
      %104 = arith.mulf %99, %103 : vector<8x32xf32>
      %105 = arith.extf %84 : vector<1x32xbf16> to vector<1x32xf32>
      %106 = vector.broadcast %105 : vector<1x32xf32> to vector<8x32xf32>
      %107 = arith.mulf %104, %106 : vector<8x32xf32>
      %108 = arith.extf %85 : vector<1x32xbf16> to vector<1x32xf32>
      %109 = vector.broadcast %108 : vector<1x32xf32> to vector<8x32xf32>
      %110 = arith.addf %107, %109 : vector<8x32xf32>
      %111 = arith.truncf %110 : vector<8x32xf32> to vector<8x32xbf16>
      %c0_61 = arith.constant 0 : index
      %c0_62 = arith.constant 0 : index
      %112 = vector.load %arg6[%c0_61, %c0_62] : memref<32x32xbf16, #tpu.memory_space<vmem>>, vector<32x32xbf16>
      %cst_63 = arith.constant dense<0.000000e+00> : vector<8x32xf32>
      %113 = tpu.matmul %111, %112, %cst_63 {dimension_numbers = #tpu.dot_dimension_numbers<[1], [0], [0], [1], [0, 0, 1, 1], [], []>} : vector<8x32xbf16>, vector<32x32xbf16>, vector<8x32xf32> -> vector<8x32xf32>
      %cst_64 = arith.constant 2.500000e-01 : f32
      %114 = vector.broadcast %cst_64 : f32 to vector<8x32xf32>
      %115 = arith.mulf %113, %114 : vector<8x32xf32>
      %c0_65 = arith.constant 0 : index
      %c0_66 = arith.constant 0 : index
      %116 = vector.load %arg16[%c0_65, %c0_66] : memref<8x32xf32, #tpu.memory_space<vmem>>, vector<8x32xf32>
      tpu.vector_store %arg16[%c0_65, %c0_66], %115 {strides = array<i32>} : memref<8x32xf32, #tpu.memory_space<vmem>>, vector<8x32xf32>,
      %cst_67 = arith.constant -1.000000e+30 : f32
      %117 = vector.broadcast %cst_67 : f32 to vector<2x8x1xf32>
      %c0_68 = arith.constant 0 : index
      %c0_69 = arith.constant 0 : index
      %c0_70 = arith.constant 0 : index
      %118 = vector.load %arg17[%c0_68, %c0_69, %c0_70] : memref<2x8x1xf32, #tpu.memory_space<vmem>>, vector<2x8x1xf32>
      tpu.vector_store %arg17[%c0_68, %c0_69, %c0_70], %117 {strides = array<i32>} : memref<2x8x1xf32, #tpu.memory_space<vmem>>, vector<2x8x1xf32>,
      %cst_71 = arith.constant 0.000000e+00 : f32
      %119 = vector.broadcast %cst_71 : f32 to vector<2x8x1xf32>
      %c0_72 = arith.constant 0 : index
      %c0_73 = arith.constant 0 : index
      %c0_74 = arith.constant 0 : index
      %120 = vector.load %arg18[%c0_72, %c0_73, %c0_74] : memref<2x8x1xf32, #tpu.memory_space<vmem>>, vector<2x8x1xf32>
      tpu.vector_store %arg18[%c0_72, %c0_73, %c0_74], %119 {strides = array<i32>} : memref<2x8x1xf32, #tpu.memory_space<vmem>>, vector<2x8x1xf32>,
      %cst_75 = arith.constant 0.000000e+00 : f32
      %121 = vector.broadcast %cst_75 : f32 to vector<2x8x16xf32>
      %c0_76 = arith.constant 0 : index
      %c0_77 = arith.constant 0 : index
      %c0_78 = arith.constant 0 : index
      %122 = vector.load %arg19[%c0_76, %c0_77, %c0_78] : memref<2x8x16xf32, #tpu.memory_space<vmem>>, vector<2x8x16xf32>
      tpu.vector_store %arg19[%c0_76, %c0_77, %c0_78], %121 {strides = array<i32>} : memref<2x8x16xf32, #tpu.memory_space<vmem>>, vector<2x8x16xf32>,
    } else {
    }
    %c0_3 = arith.constant 0 : index
    %c0_4 = arith.constant 0 : index
    %c0_5 = arith.constant 0 : index
    %5 = vector.load %arg3[%c0_3, %c0_4, %c0_5] : memref<1x64x64xbf16, #tpu.memory_space<vmem>>, vector<1x64x64xbf16>
    %6 = vector.shape_cast %5 : vector<1x64x64xbf16> to vector<64x64xbf16>
    %c0_6 = arith.constant 0 : index
    %c0_7 = arith.constant 0 : index
    %7 = vector.load %arg16[%c0_6, %c0_7] : memref<8x32xf32, #tpu.memory_space<vmem>>, vector<8x32xf32>
    %8 = arith.truncf %7 : vector<8x32xf32> to vector<8x32xbf16>
    %9 = vector.extract_strided_slice %8 {offsets = [0, 0], sizes = [8, 16], strides = [1, 1]} : vector<8x32xbf16> to vector<8x16xbf16>
    %10 = vector.extract_strided_slice %6 {offsets = [0, 0], sizes = [64, 16], strides = [1, 1]} : vector<64x64xbf16> to vector<64x16xbf16>
    %11 = vector.extract_strided_slice %6 {offsets = [0, 32], sizes = [64, 16], strides = [1, 1]} : vector<64x64xbf16> to vector<64x16xbf16>
    %cst = arith.constant dense<0.000000e+00> : vector<8x64xf32>
    %12 = tpu.matmul %9, %10, %cst {dimension_numbers = #tpu.dot_dimension_numbers<[1], [1], [0], [0], [0, 0, 1, 0], [], []>} : vector<8x16xbf16>, vector<64x16xbf16>, vector<8x64xf32> -> vector<8x64xf32>
    %c0_8 = arith.constant 0 : index
    %c0_9 = arith.constant 0 : index
    %c0_10 = arith.constant 0 : index
    %13 = vector.load %arg17[%c0_8, %c0_9, %c0_10] : memref<2x8x1xf32, #tpu.memory_space<vmem>>, vector<1x8x1xf32>
    %14 = vector.shape_cast %13 : vector<1x8x1xf32> to vector<8x1xf32>
    %cst_11 = arith.constant dense<0xFF800000> : vector<8xf32>
    %15 = vector.multi_reduction <maximumf>, %12, %cst_11 [1] : vector<8x64xf32> to vector<8xf32>
    %16 = vector.shape_cast %15 : vector<8xf32> to vector<8x1xf32>
    %17 = arith.maximumf %14, %16 : vector<8x1xf32>
    %18 = arith.subf %14, %17 : vector<8x1xf32>
    %19 = math.exp %18 : vector<8x1xf32>
    %20 = vector.broadcast %17 : vector<8x1xf32> to vector<8x64xf32>
    %21 = arith.subf %12, %20 : vector<8x64xf32>
    %22 = math.exp %21 : vector<8x64xf32>
    %c0_12 = arith.constant 0 : index
    %c0_13 = arith.constant 0 : index
    %c0_14 = arith.constant 0 : index
    %23 = vector.load %arg18[%c0_12, %c0_13, %c0_14] : memref<2x8x1xf32, #tpu.memory_space<vmem>>, vector<1x8x1xf32>
    %24 = vector.shape_cast %23 : vector<1x8x1xf32> to vector<8x1xf32>
    %25 = arith.mulf %19, %24 : vector<8x1xf32>
    %cst_15 = arith.constant dense<0.000000e+00> : vector<8xf32>
    %26 = vector.multi_reduction <add>, %22, %cst_15 [1] : vector<8x64xf32> to vector<8xf32>
    %27 = vector.shape_cast %26 : vector<8xf32> to vector<8x1xf32>
    %28 = arith.addf %25, %27 : vector<8x1xf32>
    %c0_16 = arith.constant 0 : index
    %c0_17 = arith.constant 0 : index
    %c0_18 = arith.constant 0 : index
    %29 = vector.load %arg18[%c0_16, %c0_17, %c0_18] : memref<2x8x1xf32, #tpu.memory_space<vmem>>, vector<1x8x1xf32>
    %30 = vector.shape_cast %29 : vector<1x8x1xf32> to vector<8x1xf32>
    %31 = vector.shape_cast %28 : vector<8x1xf32> to vector<1x8x1xf32>
    tpu.vector_store %arg18[%c0_16, %c0_17, %c0_18], %31 {strides = array<i32>} : memref<2x8x1xf32, #tpu.memory_space<vmem>>, vector<1x8x1xf32>,
    %c0_19 = arith.constant 0 : index
    %c0_20 = arith.constant 0 : index
    %c0_21 = arith.constant 0 : index
    %32 = vector.load %arg19[%c0_19, %c0_20, %c0_21] : memref<2x8x16xf32, #tpu.memory_space<vmem>>, vector<1x8x16xf32>
    %33 = vector.shape_cast %32 : vector<1x8x16xf32> to vector<8x16xf32>
    %34 = vector.broadcast %19 : vector<8x1xf32> to vector<8x16xf32>
    %35 = arith.mulf %34, %33 : vector<8x16xf32>
    %36 = arith.truncf %22 : vector<8x64xf32> to vector<8x64xbf16>
    %cst_22 = arith.constant dense<0.000000e+00> : vector<8x16xf32>
    %37 = tpu.matmul %36, %11, %cst_22 {dimension_numbers = #tpu.dot_dimension_numbers<[1], [0], [0], [1], [0, 0, 1, 1], [], []>} : vector<8x64xbf16>, vector<64x16xbf16>, vector<8x16xf32> -> vector<8x16xf32>
    %38 = arith.addf %35, %37 : vector<8x16xf32>
    %c0_23 = arith.constant 0 : index
    %c0_24 = arith.constant 0 : index
    %c0_25 = arith.constant 0 : index
    %39 = vector.load %arg19[%c0_23, %c0_24, %c0_25] : memref<2x8x16xf32, #tpu.memory_space<vmem>>, vector<1x8x16xf32>
    %40 = vector.shape_cast %39 : vector<1x8x16xf32> to vector<8x16xf32>
    %41 = vector.shape_cast %38 : vector<8x16xf32> to vector<1x8x16xf32>
    tpu.vector_store %arg19[%c0_23, %c0_24, %c0_25], %41 {strides = array<i32>} : memref<2x8x16xf32, #tpu.memory_space<vmem>>, vector<1x8x16xf32>,
    %c0_26 = arith.constant 0 : index
    %c0_27 = arith.constant 0 : index
    %c0_28 = arith.constant 0 : index
    %42 = vector.load %arg17[%c0_26, %c0_27, %c0_28] : memref<2x8x1xf32, #tpu.memory_space<vmem>>, vector<1x8x1xf32>
    %43 = vector.shape_cast %42 : vector<1x8x1xf32> to vector<8x1xf32>
    %44 = vector.shape_cast %17 : vector<8x1xf32> to vector<1x8x1xf32>
    tpu.vector_store %arg17[%c0_26, %c0_27, %c0_28], %44 {strides = array<i32>} : memref<2x8x1xf32, #tpu.memory_space<vmem>>, vector<1x8x1xf32>,
    %45 = vector.extract_strided_slice %8 {offsets = [0, 16], sizes = [8, 16], strides = [1, 1]} : vector<8x32xbf16> to vector<8x16xbf16>
    %46 = vector.extract_strided_slice %6 {offsets = [0, 16], sizes = [64, 16], strides = [1, 1]} : vector<64x64xbf16> to vector<64x16xbf16>
    %47 = vector.extract_strided_slice %6 {offsets = [0, 48], sizes = [64, 16], strides = [1, 1]} : vector<64x64xbf16> to vector<64x16xbf16>
    %cst_29 = arith.constant dense<0.000000e+00> : vector<8x64xf32>
    %48 = tpu.matmul %45, %46, %cst_29 {dimension_numbers = #tpu.dot_dimension_numbers<[1], [1], [0], [0], [0, 0, 1, 0], [], []>} : vector<8x16xbf16>, vector<64x16xbf16>, vector<8x64xf32> -> vector<8x64xf32>
    %c1 = arith.constant 1 : index
    %c0_30 = arith.constant 0 : index
    %c0_31 = arith.constant 0 : index
    %49 = vector.load %arg17[%c1, %c0_30, %c0_31] : memref<2x8x1xf32, #tpu.memory_space<vmem>>, vector<1x8x1xf32>
    %50 = vector.shape_cast %49 : vector<1x8x1xf32> to vector<8x1xf32>
    %cst_32 = arith.constant dense<0xFF800000> : vector<8xf32>
    %51 = vector.multi_reduction <maximumf>, %48, %cst_32 [1] : vector<8x64xf32> to vector<8xf32>
    %52 = vector.shape_cast %51 : vector<8xf32> to vector<8x1xf32>
    %53 = arith.maximumf %50, %52 : vector<8x1xf32>
    %54 = arith.subf %50, %53 : vector<8x1xf32>
    %55 = math.exp %54 : vector<8x1xf32>
    %56 = vector.broadcast %53 : vector<8x1xf32> to vector<8x64xf32>
    %57 = arith.subf %48, %56 : vector<8x64xf32>
    %58 = math.exp %57 : vector<8x64xf32>
    %c1_33 = arith.constant 1 : index
    %c0_34 = arith.constant 0 : index
    %c0_35 = arith.constant 0 : index
    %59 = vector.load %arg18[%c1_33, %c0_34, %c0_35] : memref<2x8x1xf32, #tpu.memory_space<vmem>>, vector<1x8x1xf32>
    %60 = vector.shape_cast %59 : vector<1x8x1xf32> to vector<8x1xf32>
    %61 = arith.mulf %55, %60 : vector<8x1xf32>
    %cst_36 = arith.constant dense<0.000000e+00> : vector<8xf32>
    %62 = vector.multi_reduction <add>, %58, %cst_36 [1] : vector<8x64xf32> to vector<8xf32>
    %63 = vector.shape_cast %62 : vector<8xf32> to vector<8x1xf32>
    %64 = arith.addf %61, %63 : vector<8x1xf32>
    %c1_37 = arith.constant 1 : index
    %c0_38 = arith.constant 0 : index
    %c0_39 = arith.constant 0 : index
    %65 = vector.load %arg18[%c1_37, %c0_38, %c0_39] : memref<2x8x1xf32, #tpu.memory_space<vmem>>, vector<1x8x1xf32>
    %66 = vector.shape_cast %65 : vector<1x8x1xf32> to vector<8x1xf32>
    %67 = vector.shape_cast %64 : vector<8x1xf32> to vector<1x8x1xf32>
    tpu.vector_store %arg18[%c1_37, %c0_38, %c0_39], %67 {strides = array<i32>} : memref<2x8x1xf32, #tpu.memory_space<vmem>>, vector<1x8x1xf32>,
    %c1_40 = arith.constant 1 : index
    %c0_41 = arith.constant 0 : index
    %c0_42 = arith.constant 0 : index
    %68 = vector.load %arg19[%c1_40, %c0_41, %c0_42] : memref<2x8x16xf32, #tpu.memory_space<vmem>>, vector<1x8x16xf32>
    %69 = vector.shape_cast %68 : vector<1x8x16xf32> to vector<8x16xf32>
    %70 = vector.broadcast %55 : vector<8x1xf32> to vector<8x16xf32>
    %71 = arith.mulf %70, %69 : vector<8x16xf32>
    %72 = arith.truncf %58 : vector<8x64xf32> to vector<8x64xbf16>
    %cst_43 = arith.constant dense<0.000000e+00> : vector<8x16xf32>
    %73 = tpu.matmul %72, %47, %cst_43 {dimension_numbers = #tpu.dot_dimension_numbers<[1], [0], [0], [1], [0, 0, 1, 1], [], []>} : vector<8x64xbf16>, vector<64x16xbf16>, vector<8x16xf32> -> vector<8x16xf32>
    %74 = arith.addf %71, %73 : vector<8x16xf32>
    %c1_44 = arith.constant 1 : index
    %c0_45 = arith.constant 0 : index
    %c0_46 = arith.constant 0 : index
    %75 = vector.load %arg19[%c1_44, %c0_45, %c0_46] : memref<2x8x16xf32, #tpu.memory_space<vmem>>, vector<1x8x16xf32>
    %76 = vector.shape_cast %75 : vector<1x8x16xf32> to vector<8x16xf32>
    %77 = vector.shape_cast %74 : vector<8x16xf32> to vector<1x8x16xf32>
    tpu.vector_store %arg19[%c1_44, %c0_45, %c0_46], %77 {strides = array<i32>} : memref<2x8x16xf32, #tpu.memory_space<vmem>>, vector<1x8x16xf32>,
    %c1_47 = arith.constant 1 : index
    %c0_48 = arith.constant 0 : index
    %c0_49 = arith.constant 0 : index
    %78 = vector.load %arg17[%c1_47, %c0_48, %c0_49] : memref<2x8x1xf32, #tpu.memory_space<vmem>>, vector<1x8x1xf32>
    %79 = vector.shape_cast %78 : vector<1x8x1xf32> to vector<8x1xf32>
    %80 = vector.shape_cast %53 : vector<8x1xf32> to vector<1x8x1xf32>
    tpu.vector_store %arg17[%c1_47, %c0_48, %c0_49], %80 {strides = array<i32>} : memref<2x8x1xf32, #tpu.memory_space<vmem>>, vector<1x8x1xf32>,
    %c0_i32_50 = arith.constant 0 : i32
    %81 = arith.cmpi eq, %arg1, %c0_i32_50 : i32
    %82 = arith.extui %81 : i1 to i32
    %c0_i32_51 = arith.constant 0 : i32
    %83 = arith.cmpi ne, %82, %c0_i32_51 : i32
    scf.if %83 {
      %c0_52 = arith.constant 0 : index
      %c0_53 = arith.constant 0 : index
      %84 = vector.load %arg7[%c0_52, %c0_53] : memref<32x32xbf16, #tpu.memory_space<vmem>>, vector<32x32xbf16>
      %cst_54 = arith.constant 0.000000e+00 : f32
      %85 = vector.broadcast %cst_54 : f32 to vector<8x32xf32>
      %c0_55 = arith.constant 0 : index
      %c0_56 = arith.constant 0 : index
      %c0_57 = arith.constant 0 : index
      %86 = vector.load %arg19[%c0_55, %c0_56, %c0_57] : memref<2x8x16xf32, #tpu.memory_space<vmem>>, vector<1x8x16xf32>
      %87 = vector.shape_cast %86 : vector<1x8x16xf32> to vector<8x16xf32>
      %c0_58 = arith.constant 0 : index
      %c0_59 = arith.constant 0 : index
      %c0_60 = arith.constant 0 : index
      %88 = vector.load %arg18[%c0_58, %c0_59, %c0_60] : memref<2x8x1xf32, #tpu.memory_space<vmem>>, vector<1x8x1xf32>
      %89 = vector.shape_cast %88 : vector<1x8x1xf32> to vector<8x1xf32>
      %90 = tpu.reciprocal %89 {approx = true} : vector<8x1xf32> -> vector<8x1xf32>
      %91 = vector.broadcast %90 : vector<8x1xf32> to vector<8x16xf32>
      %92 = arith.mulf %87, %91 : vector<8x16xf32>
      %93 = arith.truncf %92 : vector<8x16xf32> to vector<8x16xbf16>
      %94 = vector.extract_strided_slice %84 {offsets = [0, 0], sizes = [16, 32], strides = [1, 1]} : vector<32x32xbf16> to vector<16x32xbf16>
      %cst_61 = arith.constant dense<0.000000e+00> : vector<8x32xf32>
      %95 = tpu.matmul %93, %94, %cst_61 {dimension_numbers = #tpu.dot_dimension_numbers<[1], [0], [0], [1], [0, 0, 1, 1], [], []>} : vector<8x16xbf16>, vector<16x32xbf16>, vector<8x32xf32> -> vector<8x32xf32>
      %96 = arith.addf %85, %95 : vector<8x32xf32>
      %c1_62 = arith.constant 1 : index
      %c0_63 = arith.constant 0 : index
      %c0_64 = arith.constant 0 : index
      %97 = vector.load %arg19[%c1_62, %c0_63, %c0_64] : memref<2x8x16xf32, #tpu.memory_space<vmem>>, vector<1x8x16xf32>
      %98 = vector.shape_cast %97 : vector<1x8x16xf32> to vector<8x16xf32>
      %c1_65 = arith.constant 1 : index
      %c0_66 = arith.constant 0 : index
      %c0_67 = arith.constant 0 : index
      %99 = vector.load %arg18[%c1_65, %c0_66, %c0_67] : memref<2x8x1xf32, #tpu.memory_space<vmem>>, vector<1x8x1xf32>
      %100 = vector.shape_cast %99 : vector<1x8x1xf32> to vector<8x1xf32>
      %101 = tpu.reciprocal %100 {approx = true} : vector<8x1xf32> -> vector<8x1xf32>
      %102 = vector.broadcast %101 : vector<8x1xf32> to vector<8x16xf32>
      %103 = arith.mulf %98, %102 : vector<8x16xf32>
      %104 = arith.truncf %103 : vector<8x16xf32> to vector<8x16xbf16>
      %105 = vector.extract_strided_slice %84 {offsets = [16, 0], sizes = [16, 32], strides = [1, 1]} : vector<32x32xbf16> to vector<16x32xbf16>
      %cst_68 = arith.constant dense<0.000000e+00> : vector<8x32xf32>
      %106 = tpu.matmul %104, %105, %cst_68 {dimension_numbers = #tpu.dot_dimension_numbers<[1], [0], [0], [1], [0, 0, 1, 1], [], []>} : vector<8x16xbf16>, vector<16x32xbf16>, vector<8x32xf32> -> vector<8x32xf32>
      %107 = arith.addf %96, %106 : vector<8x32xf32>
      %108 = arith.extf %1 : vector<8x32xbf16> to vector<8x32xf32>
      %109 = arith.addf %108, %107 : vector<8x32xf32>
      %c0_69 = arith.constant 0 : index
      %c0_70 = arith.constant 0 : index
      %110 = vector.load %arg8[%c0_69, %c0_70] : memref<1x32xbf16, #tpu.memory_space<vmem>>, vector<1x32xbf16>
      %111 = arith.extf %110 : vector<1x32xbf16> to vector<1x32xf32>
      %112 = vector.broadcast %111 : vector<1x32xf32> to vector<8x32xf32>
      %113 = arith.addf %109, %112 : vector<8x32xf32>
      %c0_71 = arith.constant 0 : index
      %c0_72 = arith.constant 0 : index
      %114 = vector.load %arg9[%c0_71, %c0_72] : memref<1x32xbf16, #tpu.memory_space<vmem>>, vector<1x32xbf16>
      %c0_73 = arith.constant 0 : index
      %c0_74 = arith.constant 0 : index
      %115 = vector.load %arg10[%c0_73, %c0_74] : memref<1x32xbf16, #tpu.memory_space<vmem>>, vector<1x32xbf16>
      %cst_75 = arith.constant dense<0.000000e+00> : vector<8xf32>
      %116 = vector.multi_reduction <add>, %113, %cst_75 [1] : vector<8x32xf32> to vector<8xf32>
      %117 = vector.shape_cast %116 : vector<8xf32> to vector<8x1xf32>
      %cst_76 = arith.constant 3.200000e+01 : f32
      %118 = vector.broadcast %cst_76 : f32 to vector<8x1xf32>
      %119 = arith.divf %117, %118 : vector<8x1xf32>
      %120 = vector.broadcast %119 : vector<8x1xf32> to vector<8x32xf32>
      %121 = arith.subf %113, %120 : vector<8x32xf32>
      %122 = arith.mulf %121, %121 : vector<8x32xf32>
      %cst_77 = arith.constant dense<0.000000e+00> : vector<8xf32>
      %123 = vector.multi_reduction <add>, %122, %cst_77 [1] : vector<8x32xf32> to vector<8xf32>
      %124 = vector.shape_cast %123 : vector<8xf32> to vector<8x1xf32>
      %cst_78 = arith.constant 3.200000e+01 : f32
      %125 = vector.broadcast %cst_78 : f32 to vector<8x1xf32>
      %126 = arith.divf %124, %125 : vector<8x1xf32>
      %127 = vector.broadcast %119 : vector<8x1xf32> to vector<8x32xf32>
      %128 = arith.subf %113, %127 : vector<8x32xf32>
      %cst_79 = arith.constant 9.99999974E-6 : f32
      %129 = vector.broadcast %cst_79 : f32 to vector<8x1xf32>
      %130 = arith.addf %126, %129 : vector<8x1xf32>
      %131 = math.rsqrt %130 : vector<8x1xf32>
      %132 = vector.broadcast %131 : vector<8x1xf32> to vector<8x32xf32>
      %133 = arith.mulf %128, %132 : vector<8x32xf32>
      %134 = arith.extf %114 : vector<1x32xbf16> to vector<1x32xf32>
      %135 = vector.broadcast %134 : vector<1x32xf32> to vector<8x32xf32>
      %136 = arith.mulf %133, %135 : vector<8x32xf32>
      %137 = arith.extf %115 : vector<1x32xbf16> to vector<1x32xf32>
      %138 = vector.broadcast %137 : vector<1x32xf32> to vector<8x32xf32>
      %139 = arith.addf %136, %138 : vector<8x32xf32>
      %140 = arith.truncf %139 : vector<8x32xf32> to vector<8x32xbf16>
      %c0_80 = arith.constant 0 : index
      %c0_81 = arith.constant 0 : index
      %141 = vector.load %arg11[%c0_80, %c0_81] : memref<32x128xbf16, #tpu.memory_space<vmem>>, vector<32x128xbf16>
      %cst_82 = arith.constant dense<0.000000e+00> : vector<8x128xf32>
      %142 = tpu.matmul %140, %141, %cst_82 {dimension_numbers = #tpu.dot_dimension_numbers<[1], [0], [0], [1], [0, 0, 1, 1], [], []>} : vector<8x32xbf16>, vector<32x128xbf16>, vector<8x128xf32> -> vector<8x128xf32>
      %c0_83 = arith.constant 0 : index
      %c0_84 = arith.constant 0 : index
      %143 = vector.load %arg12[%c0_83, %c0_84] : memref<1x128xbf16, #tpu.memory_space<vmem>>, vector<1x128xbf16>
      %144 = arith.extf %143 : vector<1x128xbf16> to vector<1x128xf32>
      %145 = vector.broadcast %144 : vector<1x128xf32> to vector<8x128xf32>
      %146 = arith.addf %142, %145 : vector<8x128xf32>
      %147 = arith.mulf %146, %146 : vector<8x128xf32>
      %148 = arith.mulf %146, %147 : vector<8x128xf32>
      %cst_85 = arith.constant 4.471500e-02 : f32
      %149 = vector.broadcast %cst_85 : f32 to vector<8x128xf32>
      %150 = arith.mulf %149, %148 : vector<8x128xf32>
      %151 = arith.addf %146, %150 : vector<8x128xf32>
      %cst_86 = arith.constant 0.797884583 : f32
      %152 = vector.broadcast %cst_86 : f32 to vector<8x128xf32>
      %153 = arith.mulf %152, %151 : vector<8x128xf32>
      %154 = math.tanh %153 : vector<8x128xf32>
      %cst_87 = arith.constant 1.000000e+00 : f32
      %155 = vector.broadcast %cst_87 : f32 to vector<8x128xf32>
      %156 = arith.addf %155, %154 : vector<8x128xf32>
      %cst_88 = arith.constant 5.000000e-01 : f32
      %157 = vector.broadcast %cst_88 : f32 to vector<8x128xf32>
      %158 = arith.mulf %157, %156 : vector<8x128xf32>
      %159 = arith.mulf %146, %158 : vector<8x128xf32>
      %160 = arith.truncf %159 : vector<8x128xf32> to vector<8x128xbf16>
      %c0_89 = arith.constant 0 : index
      %c0_90 = arith.constant 0 : index
      %161 = vector.load %arg13[%c0_89, %c0_90] : memref<128x32xbf16, #tpu.memory_space<vmem>>, vector<128x32xbf16>
      %cst_91 = arith.constant dense<0.000000e+00> : vector<8x32xf32>
      %162 = tpu.matmul %160, %161, %cst_91 {dimension_numbers = #tpu.dot_dimension_numbers<[1], [0], [0], [1], [0, 0, 1, 1], [], []>} : vector<8x128xbf16>, vector<128x32xbf16>, vector<8x32xf32> -> vector<8x32xf32>
      %c0_92 = arith.constant 0 : index
      %c0_93 = arith.constant 0 : index
      %163 = vector.load %arg14[%c0_92, %c0_93] : memref<1x32xbf16, #tpu.memory_space<vmem>>, vector<1x32xbf16>
      %164 = arith.extf %163 : vector<1x32xbf16> to vector<1x32xf32>
      %165 = vector.broadcast %164 : vector<1x32xf32> to vector<8x32xf32>
      %166 = arith.addf %162, %165 : vector<8x32xf32>
      %167 = arith.addf %113, %166 : vector<8x32xf32>
      %168 = arith.truncf %167 : vector<8x32xf32> to vector<8x32xbf16>
      %c0_94 = arith.constant 0 : index
      %c0_95 = arith.constant 0 : index
      %c0_96 = arith.constant 0 : index
      %169 = vector.load %arg15[%c0_94, %c0_95, %c0_96] : memref<1x8x32xbf16, #tpu.memory_space<vmem>>, vector<1x8x32xbf16>
      %170 = vector.shape_cast %169 : vector<1x8x32xbf16> to vector<8x32xbf16>
      %171 = vector.shape_cast %168 : vector<8x32xbf16> to vector<1x8x32xbf16>
      tpu.vector_store %arg15[%c0_94, %c0_95, %c0_96], %171 {strides = array<i32>} : memref<1x8x32xbf16, #tpu.memory_space<vmem>>, vector<1x8x32xbf16>,
    } else {
    }
    return
  }
  func.func @transform_0(%arg0: i32, %arg1: i32) -> (i32, i32, i32) {
    %c0_i32 = arith.constant 0 : i32
    %c0_i32_0 = arith.constant 0 : i32
    %c0_i32_1 = arith.constant 0 : i32
    return %arg0, %c0_i32, %c0_i32_0 : i32, i32, i32
  }
  func.func @transform_1(%arg0: i32, %arg1: i32) -> (i32, i32, i32) {
    %c0_i32 = arith.constant 0 : i32
    %c0_i32_0 = arith.constant 0 : i32
    return %arg0, %arg1, %c0_i32 : i32, i32, i32
  }
  func.func @transform_2(%arg0: i32, %arg1: i32) -> (i32, i32) {
    %c0_i32 = arith.constant 0 : i32
    %c0_i32_0 = arith.constant 0 : i32
    %c0_i32_1 = arith.constant 0 : i32
    return %c0_i32, %c0_i32_0 : i32, i32
  }
  func.func @transform_3(%arg0: i32, %arg1: i32) -> (i32, i32) {
    %c0_i32 = arith.constant 0 : i32
    %c0_i32_0 = arith.constant 0 : i32
    %c0_i32_1 = arith.constant 0 : i32
    return %c0_i32, %c0_i32_0 : i32, i32
  }
  func.func @transform_4(%arg0: i32, %arg1: i32) -> (i32, i32) {
    %c0_i32 = arith.constant 0 : i32
    %c0_i32_0 = arith.constant 0 : i32
    %c0_i32_1 = arith.constant 0 : i32
    return %c0_i32, %c0_i32_0 : i32, i32
  }
  func.func @transform_5(%arg0: i32, %arg1: i32) -> (i32, i32) {
    %c0_i32 = arith.constant 0 : i32
    %c0_i32_0 = arith.constant 0 : i32
    %c0_i32_1 = arith.constant 0 : i32
    return %c0_i32, %c0_i32_0 : i32, i32
  }
  func.func @transform_6(%arg0: i32, %arg1: i32) -> (i32, i32) {
    %c0_i32 = arith.constant 0 : i32
    %c0_i32_0 = arith.constant 0 : i32
    %c0_i32_1 = arith.constant 0 : i32
    return %c0_i32, %c0_i32_0 : i32, i32
  }
  func.func @transform_7(%arg0: i32, %arg1: i32) -> (i32, i32) {
    %c0_i32 = arith.constant 0 : i32
    %c0_i32_0 = arith.constant 0 : i32
    %c0_i32_1 = arith.constant 0 : i32
    return %c0_i32, %c0_i32_0 : i32, i32
  }
  func.func @transform_8(%arg0: i32, %arg1: i32) -> (i32, i32) {
    %c0_i32 = arith.constant 0 : i32
    %c0_i32_0 = arith.constant 0 : i32
    %c0_i32_1 = arith.constant 0 : i32
    return %c0_i32, %c0_i32_0 : i32, i32
  }
  func.func @transform_9(%arg0: i32, %arg1: i32) -> (i32, i32) {
    %c0_i32 = arith.constant 0 : i32
    %c0_i32_0 = arith.constant 0 : i32
    %c0_i32_1 = arith.constant 0 : i32
    return %c0_i32, %c0_i32_0 : i32, i32
  }
  func.func @transform_10(%arg0: i32, %arg1: i32) -> (i32, i32) {
    %c0_i32 = arith.constant 0 : i32
    %c0_i32_0 = arith.constant 0 : i32
    %c0_i32_1 = arith.constant 0 : i32
    return %c0_i32, %c0_i32_0 : i32, i32
  }
  func.func @transform_11(%arg0: i32, %arg1: i32) -> (i32, i32) {
    %c0_i32 = arith.constant 0 : i32
    %c0_i32_0 = arith.constant 0 : i32
    %c0_i32_1 = arith.constant 0 : i32
    return %c0_i32, %c0_i32_0 : i32, i32
  }
  func.func @transform_12(%arg0: i32, %arg1: i32) -> (i32, i32) {
    %c0_i32 = arith.constant 0 : i32
    %c0_i32_0 = arith.constant 0 : i32
    %c0_i32_1 = arith.constant 0 : i32
    return %c0_i32, %c0_i32_0 : i32, i32
  }
  func.func @transform_13(%arg0: i32, %arg1: i32) -> (i32, i32, i32) {
    %c0_i32 = arith.constant 0 : i32
    %c0_i32_0 = arith.constant 0 : i32
    %c0_i32_1 = arith.constant 0 : i32
    return %arg0, %c0_i32, %c0_i32_0 : i32, i32, i32
  }
}

module attributes {stable_mosaic.version = 11 : i64} {
  func.func @_classifier_kernel(%arg0: memref<2x8x32xbf16, #tpu.memory_space<vmem>>, %arg1: memref<1x32xbf16, #tpu.memory_space<vmem>>, %arg2: memref<1x32xbf16, #tpu.memory_space<vmem>>, %arg3: memref<32x10xbf16, #tpu.memory_space<vmem>>, %arg4: memref<1x10xbf16, #tpu.memory_space<vmem>>, %arg5: memref<2x10xbf16, #tpu.memory_space<vmem>>) attributes {dimension_semantics = [], scalar_prefetch = 0 : i64, scratch_operands = 0 : i64, tpu.core_type = #tpu.core_type<tc>} {
    %c0 = arith.constant 0 : index
    %c0_0 = arith.constant 0 : index
    %c0_1 = arith.constant 0 : index
    %0 = vector.load %arg0[%c0, %c0_0, %c0_1] : memref<2x8x32xbf16, #tpu.memory_space<vmem>>, vector<2x8x32xbf16>
    %1 = arith.extf %0 : vector<2x8x32xbf16> to vector<2x8x32xf32>
    %cst = arith.constant dense<0.000000e+00> : vector<2x32xf32>
    %2 = vector.multi_reduction <add>, %1, %cst [1] : vector<2x8x32xf32> to vector<2x32xf32>
    %cst_2 = arith.constant 8.000000e+00 : f32
    %3 = vector.broadcast %cst_2 : f32 to vector<2x32xf32>
    %4 = arith.divf %2, %3 : vector<2x32xf32>
    %c0_3 = arith.constant 0 : index
    %c0_4 = arith.constant 0 : index
    %5 = vector.load %arg1[%c0_3, %c0_4] : memref<1x32xbf16, #tpu.memory_space<vmem>>, vector<1x32xbf16>
    %c0_5 = arith.constant 0 : index
    %c0_6 = arith.constant 0 : index
    %6 = vector.load %arg2[%c0_5, %c0_6] : memref<1x32xbf16, #tpu.memory_space<vmem>>, vector<1x32xbf16>
    %cst_7 = arith.constant dense<0.000000e+00> : vector<2xf32>
    %7 = vector.multi_reduction <add>, %4, %cst_7 [1] : vector<2x32xf32> to vector<2xf32>
    %8 = vector.shape_cast %7 : vector<2xf32> to vector<2x1xf32>
    %cst_8 = arith.constant 3.200000e+01 : f32
    %9 = vector.broadcast %cst_8 : f32 to vector<2x1xf32>
    %10 = arith.divf %8, %9 : vector<2x1xf32>
    %11 = vector.broadcast %10 : vector<2x1xf32> to vector<2x32xf32>
    %12 = arith.subf %4, %11 : vector<2x32xf32>
    %13 = arith.mulf %12, %12 : vector<2x32xf32>
    %cst_9 = arith.constant dense<0.000000e+00> : vector<2xf32>
    %14 = vector.multi_reduction <add>, %13, %cst_9 [1] : vector<2x32xf32> to vector<2xf32>
    %15 = vector.shape_cast %14 : vector<2xf32> to vector<2x1xf32>
    %cst_10 = arith.constant 3.200000e+01 : f32
    %16 = vector.broadcast %cst_10 : f32 to vector<2x1xf32>
    %17 = arith.divf %15, %16 : vector<2x1xf32>
    %18 = vector.broadcast %10 : vector<2x1xf32> to vector<2x32xf32>
    %19 = arith.subf %4, %18 : vector<2x32xf32>
    %cst_11 = arith.constant 9.99999974E-6 : f32
    %20 = vector.broadcast %cst_11 : f32 to vector<2x1xf32>
    %21 = arith.addf %17, %20 : vector<2x1xf32>
    %22 = math.rsqrt %21 : vector<2x1xf32>
    %23 = vector.broadcast %22 : vector<2x1xf32> to vector<2x32xf32>
    %24 = arith.mulf %19, %23 : vector<2x32xf32>
    %25 = arith.extf %5 : vector<1x32xbf16> to vector<1x32xf32>
    %26 = vector.broadcast %25 : vector<1x32xf32> to vector<2x32xf32>
    %27 = arith.mulf %24, %26 : vector<2x32xf32>
    %28 = arith.extf %6 : vector<1x32xbf16> to vector<1x32xf32>
    %29 = vector.broadcast %28 : vector<1x32xf32> to vector<2x32xf32>
    %30 = arith.addf %27, %29 : vector<2x32xf32>
    %31 = arith.truncf %30 : vector<2x32xf32> to vector<2x32xbf16>
    %c0_12 = arith.constant 0 : index
    %c0_13 = arith.constant 0 : index
    %32 = vector.load %arg3[%c0_12, %c0_13] : memref<32x10xbf16, #tpu.memory_space<vmem>>, vector<32x10xbf16>
    %cst_14 = arith.constant dense<0.000000e+00> : vector<2x10xf32>
    %33 = tpu.matmul %31, %32, %cst_14 {dimension_numbers = #tpu.dot_dimension_numbers<[1], [0], [0], [1], [0, 0, 1, 1], [], []>} : vector<2x32xbf16>, vector<32x10xbf16>, vector<2x10xf32> -> vector<2x10xf32>
    %c0_15 = arith.constant 0 : index
    %c0_16 = arith.constant 0 : index
    %34 = vector.load %arg4[%c0_15, %c0_16] : memref<1x10xbf16, #tpu.memory_space<vmem>>, vector<1x10xbf16>
    %35 = arith.extf %34 : vector<1x10xbf16> to vector<1x10xf32>
    %36 = vector.broadcast %35 : vector<1x10xf32> to vector<2x10xf32>
    %37 = arith.addf %33, %36 : vector<2x10xf32>
    %38 = arith.truncf %37 : vector<2x10xf32> to vector<2x10xbf16>
    %c0_17 = arith.constant 0 : index
    %c0_18 = arith.constant 0 : index
    %39 = vector.load %arg5[%c0_17, %c0_18] : memref<2x10xbf16, #tpu.memory_space<vmem>>, vector<2x10xbf16>
    tpu.vector_store %arg5[%c0_17, %c0_18], %38 {strides = array<i32>} : memref<2x10xbf16, #tpu.memory_space<vmem>>, vector<2x10xbf16>,
    return
  }
}

</mosaic_0001>

<bundles_post_ra>
// kernel: perceiver_forward.13
= control target key start
LH: loop header
LB: loop body
LE: loop exit
PB: predicated region body
PF: predicated region fallthrough
CT: control target
= control target key end

     0   :  { %vm26_vm0 = vcmask 261120   ;;  %v224_v3 = vmov 8.0   ;;  %s286_s0 = inlined_call_operand.vmem [shape: bf16[2,8,32], index: 0, kind: input, shape index: {}]   ;;  %s287_s1 = inlined_call_operand.vmem [shape: bf16[1,32], index: 1, kind: input, shape index: {}]   ;;  %s288_s2 = inlined_call_operand.vmem [shape: bf16[1,32], index: 2, kind: input, shape index: {}]   ;;  %s289_s3 = inlined_call_operand.vmem [shape: bf16[32,10], index: 3, kind: input, shape index: {}]   ;;  %s290_s4 = inlined_call_operand.vmem [shape: bf16[1,10], index: 4, kind: input, shape index: {}]   ;;  %s291_s5 = inlined_call_operand.hbm [shape: bf16[2,10], index: 5, kind: output, shape index: {}]  }
   0x1   :  { %v186_v0 = vld [vmem:[%s286_s0] sm:$0xff]   ;;  %192 = vrcp.f32 %v224_v3 }
   0x2   :  { %v187_v1 = vunpack.c.l.bf16 %v186_v0  ;;  %v188_v2 = vunpack.c.h.bf16 %v186_v0 }
   0x3   :  { %10 = vsyncpa [#allocation3], 0  ;;  %vm54_vm2 = vcmask 1041409   ;;  %vm57_vm3 = vcmask 254976   ;;  %v225_v28 = vmov 32.0   ;;  %v184_v45 = vld [vmem:[%s289_s3 + $0x8] sm:$0xff] }
   0x4   :  { %v27_v4 = vsel %vm26_vm0, %v187_v1, 0.0  ;;  %v34_v5 = vsel %vm26_vm0, %v188_v2, 0.0  ;;  %194 = vrcp.f32 %v225_v28  ;;  %148 = vmatpush.bf16.msra.mxu0 %v184_v45  ;;  %v183_v46 = vld [vmem:[%s289_s3] sm:$0xff]  ;;  %s226_s3 = smov [#allocation2]   ;;  %s165_s30 = sshll.u32 %s291_s5, 4  ;;  %vm156_vm8 = vcmask 73728   ;;  %s166_s30 = int_to_ptr.hbm [resolvable:$true] %s165_s30 }
   0x5   :  { %v28_v6 = vrot.slane %v27_v4, 4  ;;  %v35_v7 = vrot.slane %v34_v5, 4  ;;  %v50_v53 = vld [vmem:[%s287_s1] sm:$0x1]  ;;  %s163_s27 = sshll.u32 %s226_s3, 4  ;;  %s164_s27 = int_to_ptr.vmem [resolvable:$true] %s163_s27 }
   0x6   :  { %v51_v55 = vld [vmem:[%s288_s2] sm:$0x1]  ;;  %v103_v56 = vunpack.c.l.bf16 %v50_v53 }
   0x7   :  { %v29_v8 = vadd.f32 %v28_v6, %v27_v4  ;;  %v36_v9 = vadd.f32 %v35_v7, %v34_v5  ;;  %v193_v10 = vpop.eup %192  ;;  %v107_v58 = vunpack.c.l.bf16 %v51_v55 }
   0x8   :  { %v42_v13 = vmul.f32 8.0, %v193_v10  ;;  %vm46_vm1 = vweird.f32 %v193_v10  ;;  %149 = vmatpush.bf16.msra.mxu0 %v183_v46  ;;  %v104_v60 = vperm.slane %v103_v56, 0 }
   0x9   :  { %v30_v11 = vrot.slane %v29_v8, 2  ;;  %v37_v12 = vrot.slane %v36_v9, 2  ;;  %v108_v0 = vperm.slane %v107_v58, 0 }
   0xa   :  { %v43_v16 = vsub.f32 1.0, %v42_v13  ;;  %v195_v29 = vpop.eup %194  ;;  %v117_v13 = vld [vmem:[%s290_s4] sm:$0x1] }
   0xb   :  { %v31_v14 = vadd.f32 %v30_v11, %v29_v8  ;;  %v38_v15 = vadd.f32 %v37_v12, %v36_v9  ;;  %v62_v30 = vmul.f32 32.0, %v195_v29  ;;  %vm66_vm4 = vweird.f32 %v195_v29 }
   0xc   :  { %v44_v19 = vmul.f32 %v193_v10, %v43_v16 }
   0xd   :  { %v32_v17 = vrot.slane %v31_v14, 1  ;;  %v39_v18 = vrot.slane %v38_v15, 1  ;;  %v63_v31 = vsub.f32 1.0, %v62_v30 }
   0xe   :  { %v45_v22 = vadd.f32 %v193_v10, %v44_v19 }
   0xf   :  { %v33_v20 = vadd.f32 %v32_v17, %v31_v14  ;;  %v40_v21 = vadd.f32 %v39_v18, %v38_v15  ;;  %v64_v32 = vmul.f32 %v195_v29, %v63_v31  ;;  %v118_v14 = vunpack.c.l.bf16 %v117_v13 }
  0x10   :  { %v47_v23 = vsel %vm46_vm1, %v193_v10, %v45_v22 }
  0x11   :  { %v48_v24 = vmul.f32 %v47_v23, %v33_v20  ;;  %v49_v25 = vmul.f32 %v47_v23, %v40_v21  ;;  %v65_v33 = vadd.f32 %v195_v29, %v64_v32  ;;  %v119_v15 = vperm.slane %v118_v14, 0 }
  0x13   :  { %v55_v26 = vsel %vm54_vm2, %v49_v25, %v48_v24  ;;  %v67_v34 = vsel %vm66_vm4, %v195_v29, %v65_v33 }
  0x14   :  { %v58_v27 = vsel %vm57_vm3, %v55_v26, 0.0 }
  0x15   :  { %59 = vadd.xlane.f32.xlu0 %v58_v27 }
  0x88   :  { %v60_v35 = vpop.xlane.xlu0 %59 }
  0x89   :  { %v68_v36 = vmul.f32 %v67_v34, %v60_v35 }
  0x8b   :  { %v70_v37 = vrot.slane %v68_v36, 1  ;;  %v73_v38 = vsub.f32 %v48_v24, %v68_v36 }
  0x8d   :  { %v74_v39 = vsub.f32 %v49_v25, %v70_v37  ;;  %v75_v41 = vmul.f32 %v73_v38, %v73_v38 }
  0x8f   :  { %v76_v40 = vmul.f32 %v74_v39, %v74_v39 }
  0x91   :  { %v79_v42 = vrot.slane %v76_v40, 7 }
  0x93   :  { %v80_v43 = vsel %vm54_vm2, %v79_v42, %v75_v41 }
  0x94   :  { %v82_v44 = vsel %vm57_vm3, %v80_v43, 0.0 }
  0x95   :  { %83 = vadd.xlane.f32.xlu0 %v82_v44 }
 0x108   :  { %v84_v47 = vpop.xlane.xlu0 %83 }
 0x109   :  { %v85_v48 = vmul.f32 %v84_v47, %v67_v34 }
 0x10b   :  { %v86_v49 = vadd.f32 1e-05, %v85_v48 }
 0x10d   :  { %196 = vrsqrt.f32 %v86_v49  ;;  %vm93_vm6 = vweird.f32 %v86_v49 }
 0x113   :  { %v197_v50 = vpop.eup %196 }
 0x114   :  { %v88_v51 = vmul.f32 %v197_v50, %v86_v49  ;;  %vm94_vm5 = vweird.f32 %v197_v50 }
 0x115   :  { %vm95_vm7 = vmor %vm93_vm6, %vm94_vm5 }
 0x116   :  { %v89_v52 = vmul.f32 %v197_v50, %v88_v51 }
 0x118   :  { %v90_v54 = vmul.f32 0.5, %v89_v52 }
 0x11a   :  { %v91_v57 = vsub.f32 1.5, %v90_v54 }
 0x11c   :  { %v92_v59 = vmul.f32 %v197_v50, %v91_v57 }
 0x11e   :  { %v96_v61 = vsel %vm95_vm7, %v197_v50, %v92_v59 }
 0x11f   :  { %v98_v62 = vrot.slane %v96_v61, 1  ;;  %v101_v63 = vmul.f32 %v96_v61, %v73_v38 }
 0x121   :  { %v102_v1 = vmul.f32 %v98_v62, %v74_v39  ;;  %v105_v2 = vmul.f32 %v104_v60, %v101_v63 }
 0x123   :  { %v106_v3 = vmul.f32 %v104_v60, %v102_v1  ;;  %v109_v4 = vadd.f32 %v108_v0, %v105_v2 }
 0x125   :  { %v110_v5 = vadd.f32 %v108_v0, %v106_v3  ;;  %v111_v6 = vpack.c.bf16 %v109_v4, %v109_v4 }
 0x127   :  { %v112_v7 = vpack.c.bf16 %v110_v5, %v110_v5  ;;  %v122_v9 = vunpack.c.l.b16 %v111_v6 }
 0x129   :  { %v123_v8 = vunpack.c.l.b16 %v112_v7 }
 0x12b   :  { %v124_v10 = vrot.slane %v123_v8, 7 }
 0x12d   :  { %v125_v11 = vsel %vm54_vm2, %v124_v10, %v122_v9 }
 0x12e   :  { %v126_v12 = vpack.c.b16 %v125_v11, %v125_v11 }
 0x130   :  { %182 = vmatmul.msk.bf16.vlgmr.msra.gmra.mxu0 %vm26_vm0, %v126_v12 }
 0x1ad   :  { %v151_v16 = vpop.f32.mrf.mxu0 }
 0x1ae   :  { %v152_v17 = vadd.f32 %v151_v16, %v119_v15 }
 0x1b0   :  { %v155_v18 = vpack.c.bf16 %v152_v17, %v152_v17 }
 0x1b2   :  { %157 = vst.msk [vmem:[#allocation2] sm:$0x1] %vm156_vm8, %v155_v18 }
 0x1b3   :  { %168 = dma.vmem_to_hbm [thread:$0]  %s164_s27, 16, %s166_s30, [#allocation3]  }
 0x1b5   :  { %v153_v19 = vpop.f32.mrf.mxu0 }
 0x1b6   :  { %222 = dma.done.wait [#allocation3], 16  }
 0x1b7   :  { %223 = vsyncadd [#allocation3], 4294967280 }
 0x1b8   :  { %173 = vsyncpa [#allocation3], 1 }

// kernel: perceiver_forward.7
= control target key start
LH: loop header
LB: loop body
LE: loop exit
PB: predicated region body
PF: predicated region fallthrough
CT: control target
= control target key end

     0   :  { %s664_s15 = smov 0   ;;  %s871_s0 = inlined_call_operand.vmem [shape: bf16[128,22], index: 0, kind: input, shape index: {}]   ;;  %s872_s1 = inlined_call_operand.vmem [shape: bf16[1,22], index: 1, kind: input, shape index: {}]   ;;  %s873_s2 = inlined_call_operand.vmem [shape: bf16[1,22], index: 2, kind: input, shape index: {}]   ;;  %s874_s3 = inlined_call_operand.vmem [shape: bf16[22,64], index: 3, kind: input, shape index: {}]   ;;  %s875_s4 = inlined_call_operand.vmem [shape: bf16[128,64], index: 4, kind: output, shape index: {}]  }
   0x1 LB: > { %s558_s16 = sadd.s32 4294967295, %s636_s15   ;;  %p562_p0 = scmp.ge.s32.totalorder %s636_s15, 1  ;;  %s636_s15 = sphi %s664_s15, %s14_s15  }
   0x2   : > { %p163_p1 = scmp.lt.s32.totalorder %s636_s15, 3 }
   0x4   : > { %p164_p2 = pnand %p562_p0, %p163_p1 }
   0x5   : > { %s563_s17 = sshll.u32 (!%p164_p2), %s558_s16, 3 }
   0x6   : > { %167 = sbr.rel (%p164_p2) target bundleno = 449 (0x1c1), region = 36  ;;  %p190_p3 = scmp.lt.s32.totalorder (!%p164_p2), %s563_s17, 15 }
   0xb   : > { %s883_s17 = smov (!%p190_p3, %s563_s17), 15  ;;  %vm220_vm0 = vcmask 179200   ;;  %v638_v20 = vmov 22.0   ;;  %vm452_vm2 = vcmask 1042432  }
   0xc   : > { %s564_s18 = sshll.u32 %s883_s17, 2  ;;  %612 = vrcp.f32 %v638_v20 }
   0xd   : > { %s193_s21 = scalar_lea.vmem %s871_s0, %s564_s18  ;;  %s199_s6 = scalar_lea.vmem %s875_s4, %s564_s18 }
   0xe   : > { %v596_v0 = vld [vmem:[%s193_s21 + $0x18] sm:$0xff]   ;;  %v595_v1 = vld [vmem:[%s193_s21 + $0x10] sm:$0xff]   ;;  %v579_v2 = vld [vmem:[%s193_s21] sm:$0xff]  }
   0xf   : > { %v592_v3 = vunpack.c.l.bf16 %v596_v0  ;;  %v588_v4 = vunpack.c.l.bf16 %v595_v1  ;;  %v580_v5 = vunpack.c.l.bf16 %v579_v2  ;;  %v593_v9 = vunpack.c.h.bf16 %v596_v0  ;;  %v594_v15 = vld [vmem:[%s193_s21 + $0x8] sm:$0xff]  }
  0x10   : > { %v589_v10 = vunpack.c.h.bf16 %v595_v1  ;;  %v581_v11 = vunpack.c.h.bf16 %v579_v2  ;;  %v584_v16 = vunpack.c.l.bf16 %v594_v15  ;;  %v585_v17 = vunpack.c.h.bf16 %v594_v15 }
  0x11   : > { %v239_v6 = vsel %vm220_vm0, %v592_v3, 0.0  ;;  %v233_v7 = vsel %vm220_vm0, %v588_v4, 0.0  ;;  %v221_v8 = vsel %vm220_vm0, %v580_v5, 0.0  ;;  %v242_v12 = vsel %vm220_vm0, %v593_v9, 0.0 }
  0x12   : > { %240 = vadd.xlane.f32.xlu1 %v239_v6  ;;  %234 = vadd.xlane.f32.xlu0 %v233_v7  ;;  %v236_v13 = vsel %vm220_vm0, %v589_v10, 0.0  ;;  %v224_v14 = vsel %vm220_vm0, %v581_v11, 0.0  ;;  %v227_v18 = vsel %vm220_vm0, %v584_v16, 0.0  ;;  %v230_v19 = vsel %vm220_vm0, %v585_v17, 0.0  ;;  %v613_v21 = vpop.eup %612 }
  0x13   : > { %222 = vadd.xlane.f32.xlu2 %v221_v8  ;;  %v246_v22 = vmul.f32 22.0, %v613_v21  ;;  %vm250_vm1 = vweird.f32 %v613_v21 }
  0x15   : > { %v247_v23 = vsub.f32 1.0, %v246_v22 }
  0x17   : > { %v248_v24 = vmul.f32 %v613_v21, %v247_v23 }
  0x19   : > { %v249_v25 = vadd.f32 %v613_v21, %v248_v24 }
  0x1a   : > { %243 = vadd.xlane.f32.xlu1 %v242_v12  ;;  %237 = vadd.xlane.f32.xlu0 %v236_v13  ;;  %v577_v13 = vld [vmem:[%s874_s3] sm:$0xff] }
  0x1b   : > { %225 = vadd.xlane.f32.xlu2 %v224_v14  ;;  %v688_v26 = vsel %vm250_vm1, %v613_v21, %v249_v25 }
  0x22   : > { %228 = vadd.xlane.f32.xlu0 %v227_v18  ;;  %231 = vadd.xlane.f32.xlu1 %v230_v19 }
  0x85   : > { %v241_v27 = vpop.xlane.xlu1 %240  ;;  %v235_v28 = vpop.xlane.xlu0 %234 }
  0x86   : > { %v258_v29 = vmul.f32 %v688_v26, %v241_v27  ;;  %v256_v30 = vmul.f32 %v688_v26, %v235_v28  ;;  %v223_v31 = vpop.xlane.xlu2 %222 }
  0x87   : > { %v252_v40 = vmul.f32 %v688_v26, %v223_v31 }
  0x88   : > { %v692_v32 = vsub.f32 %v592_v3, %v258_v29  ;;  %v694_v33 = vsub.f32 %v588_v4, %v256_v30  ;;  %v430_v3 = vld [vmem:[%s874_s3 + $0x8] sm:$0x7]  ;;  %v210_v30 = vld [vmem:[%s872_s1] sm:$0x1] }
  0x89   : > { %v712_v48 = vsub.f32 %v580_v5, %v252_v40  ;;  %v436_v4 = vunpack.c.l.b16 %v430_v3  ;;  %v404_v40 = vunpack.c.l.bf16 %v210_v30 }
  0x8a   : > { %v274_v34 = vmul.f32 %v692_v32, %v692_v32  ;;  %v272_v35 = vmul.f32 %v694_v33, %v694_v33 }
  0x8b   : > { %v268_v59 = vmul.f32 %v712_v48, %v712_v48  ;;  %v438_v7 = vpack.c.b16 %v436_v4, %v436_v4 }
  0x8c   : > { %v294_v36 = vsel %vm220_vm0, %v274_v34, 0.0  ;;  %v288_v37 = vsel %vm220_vm0, %v272_v35, 0.0 }
  0x8d   : > { %v244_v38 = vpop.xlane.xlu1 %243  ;;  %v238_v39 = vpop.xlane.xlu0 %237  ;;  %295 = vadd.xlane.f32.xlu1 %v294_v36  ;;  %289 = vadd.xlane.f32.xlu2 %v288_v37  ;;  %v276_v63 = vsel %vm220_vm0, %v268_v59, 0.0  ;;  %v792_v59 = vperm.slane %v404_v40, 0 }
  0x8e   : > { %v259_v41 = vmul.f32 %v688_v26, %v244_v38  ;;  %v257_v42 = vmul.f32 %v688_v26, %v238_v39  ;;  %v226_v43 = vpop.xlane.xlu2 %225 }
  0x8f   : > { %v253_v44 = vmul.f32 %v688_v26, %v226_v43 }
  0x90   : > { %v706_v45 = vsub.f32 %v593_v9, %v259_v41  ;;  %v708_v46 = vsub.f32 %v589_v10, %v257_v42  ;;  %v454_v10 = vsel %vm452_vm2, %v438_v7, 0 }
  0x91   : > { %v710_v47 = vsub.f32 %v581_v11, %v253_v44  ;;  %598 = vmatpush.bf16.msra.mxu2 %v454_v10  ;;  %599 = vmatpush.bf16.msra.mxu3 %v454_v10 }
  0x92   : > { %v273_v49 = vmul.f32 %v708_v46, %v708_v46  ;;  %v275_v50 = vmul.f32 %v706_v45, %v706_v45  ;;  %462 = vmatpush.bf16.msra.mxu0 %v454_v10  ;;  %597 = vmatpush.bf16.msra.mxu1 %v454_v10 }
  0x93   : > { %v269_v51 = vmul.f32 %v710_v47, %v710_v47 }
  0x94   : > { %v291_v52 = vsel %vm220_vm0, %v273_v49, 0.0  ;;  %v297_v53 = vsel %vm220_vm0, %v275_v50, 0.0 }
  0x95   : > { %292 = vadd.xlane.f32.xlu0 %v291_v52  ;;  %v229_v54 = vpop.xlane.xlu0 %228  ;;  %298 = vadd.xlane.f32.xlu2 %v297_v53  ;;  %v279_v55 = vsel %vm220_vm0, %v269_v51, 0.0  ;;  %v232_v56 = vpop.xlane.xlu1 %231  ;;  %v211_v51 = vld [vmem:[%s873_s2] sm:$0x1] }
  0x96   : > { %v254_v57 = vmul.f32 %v688_v26, %v229_v54  ;;  %280 = vadd.xlane.f32.xlu1 %v279_v55  ;;  %v255_v58 = vmul.f32 %v688_v26, %v232_v56  ;;  %601 = vmatpush.bf16.msra.mxu2 %v577_v13 }
  0x97   : > { %602 = vmatpush.bf16.msra.mxu3 %v577_v13  ;;  %463 = vmatpush.bf16.msra.mxu0 %v577_v13 }
  0x98   : > { %v727_v60 = vsub.f32 %v584_v16, %v254_v57  ;;  %v729_v61 = vsub.f32 %v585_v17, %v255_v58  ;;  %600 = vmatpush.bf16.msra.mxu1 %v577_v13 }
  0x9a   : > { %v270_v62 = vmul.f32 %v727_v60, %v727_v60  ;;  %v271_v1 = vmul.f32 %v729_v61, %v729_v61 }
  0x9c   : > { %v282_v0 = vsel %vm220_vm0, %v270_v62, 0.0  ;;  %v285_v2 = vsel %vm220_vm0, %v271_v1, 0.0 }
  0x9d   : > { %283 = vadd.xlane.f32.xlu2 %v282_v0  ;;  %277 = vadd.xlane.f32.xlu0 %v276_v63  ;;  %v414_v0 = vunpack.c.l.bf16 %v211_v51 }
  0xa5   : > { %286 = vadd.xlane.f32.xlu0 %v285_v2 }
 0x100   : > { %v296_v5 = vpop.xlane.xlu1 %295  ;;  %v290_v6 = vpop.xlane.xlu2 %289 }
 0x101   : > { %v306_v8 = vmul.f32 %v296_v5, %v688_v26  ;;  %v304_v9 = vmul.f32 %v290_v6, %v688_v26 }
 0x103   : > { %v743_v11 = vadd.f32 1e-05, %v306_v8  ;;  %v312_v12 = vadd.f32 1e-05, %v304_v9 }
 0x105   : > { %614 = vrsqrt.f32 %v743_v11  ;;  %vm382_vm3 = vweird.f32 %v743_v11  ;;  %vm362_vm6 = vweird.f32 %v312_v12 }
 0x106   : > { %616 = vrsqrt.f32 %v312_v12 }
 0x108   : > { %v293_v14 = vpop.xlane.xlu0 %292  ;;  %v299_v15 = vpop.xlane.xlu2 %298 }
 0x109   : > { %v305_v16 = vmul.f32 %v293_v14, %v688_v26  ;;  %v281_v17 = vpop.xlane.xlu1 %280  ;;  %v307_v18 = vmul.f32 %v299_v15, %v688_v26 }
 0x10a   : > { %v301_v19 = vmul.f32 %v281_v17, %v688_v26 }
 0x10b   : > { %v752_v20 = vpop.eup %614  ;;  %v754_v21 = vadd.f32 1e-05, %v305_v16  ;;  %v756_v22 = vadd.f32 1e-05, %v307_v18  ;;  %v415_v18 = vperm.slane %v414_v0, 0 }
 0x10c   : > { %v617_v23 = vpop.eup %616  ;;  %v377_v24 = vmul.f32 %v752_v20, %v743_v11  ;;  %v760_v25 = vadd.f32 1e-05, %v301_v19  ;;  %vm383_vm5 = vweird.f32 %v752_v20 }
 0x10d   : > { %v357_v27 = vmul.f32 %v617_v23, %v312_v12  ;;  %618 = vrsqrt.f32 %v754_v21  ;;  %vm363_vm4 = vweird.f32 %v617_v23  ;;  %vm372_vm8 = vweird.f32 %v754_v21  ;;  %vm802_vm9 = vmor %vm382_vm3, %vm383_vm5 }
 0x10e   : > { %v378_v28 = vmul.f32 %v752_v20, %v377_v24  ;;  %620 = vrsqrt.f32 %v760_v25  ;;  %vm787_vm7 = vmor %vm362_vm6, %vm363_vm4  ;;  %vm332_vm10 = vweird.f32 %v760_v25  ;;  %vm392_vm13 = vweird.f32 %v756_v22 }
 0x10f   : > { %v358_v29 = vmul.f32 %v617_v23, %v357_v27  ;;  %622 = vrsqrt.f32 %v756_v22 }
 0x110   : > { %v379_v31 = vmul.f32 0.5, %v378_v28  ;;  %v278_v34 = vpop.xlane.xlu0 %277  ;;  %v284_v35 = vpop.xlane.xlu2 %283 }
 0x111   : > { %v359_v36 = vmul.f32 0.5, %v358_v29  ;;  %v300_v37 = vmul.f32 %v278_v34, %v688_v26  ;;  %v302_v38 = vmul.f32 %v284_v35, %v688_v26 }
 0x112   : > { %v380_v39 = vsub.f32 1.5, %v379_v31 }
 0x113   : > { %v619_v41 = vpop.eup %618  ;;  %v360_v42 = vsub.f32 1.5, %v359_v36  ;;  %v772_v43 = vadd.f32 1e-05, %v300_v37  ;;  %v778_v50 = vadd.f32 1e-05, %v302_v38 }
 0x114   : > { %v774_v44 = vpop.eup %620  ;;  %v367_v49 = vmul.f32 %v619_v41, %v754_v21  ;;  %v381_v53 = vmul.f32 %v752_v20, %v380_v39  ;;  %vm373_vm11 = vweird.f32 %v619_v41 }
 0x115   : > { %v623_v52 = vpop.eup %622  ;;  %v361_v54 = vmul.f32 %v617_v23, %v360_v42  ;;  %v327_v55 = vmul.f32 %v774_v44, %v760_v25  ;;  %624 = vrsqrt.f32 %v772_v43  ;;  %vm333_vm12 = vweird.f32 %v774_v44  ;;  %vm374_vm15 = vmor %vm372_vm8, %vm373_vm11 }
 0x116   : > { %v368_v57 = vmul.f32 %v619_v41, %v367_v49  ;;  %v387_v58 = vmul.f32 %v623_v52, %v756_v22  ;;  %626 = vrsqrt.f32 %v778_v50  ;;  %v385_v5 = vsel %vm802_vm9, %v752_v20, %v381_v53  ;;  %vm822_vm1 = vmor %vm332_vm10, %vm333_vm12 }
 0x117   : > { %v365_v62 = vsel %vm787_vm7, %v617_v23, %v361_v54  ;;  %v328_v63 = vmul.f32 %v774_v44, %v327_v55  ;;  %vm393_vm14 = vweird.f32 %v623_v52  ;;  %v402_v14 = vmul.f32 %v385_v5, %v692_v32 }
 0x118   : > { %v369_v2 = vmul.f32 0.5, %v368_v57  ;;  %v388_v3 = vmul.f32 %v623_v52, %v387_v58  ;;  %v287_v4 = vpop.xlane.xlu0 %286  ;;  %v400_v8 = vmul.f32 %v365_v62, %v694_v33  ;;  %vm394_vm2 = vmor %vm392_vm13, %vm393_vm14  ;;  %vm322_vm3 = vweird.f32 %v772_v43 }
 0x119   : > { %v329_v6 = vmul.f32 0.5, %v328_v63  ;;  %v303_v7 = vmul.f32 %v287_v4, %v688_v26  ;;  %v412_v30 = vmul.f32 %v792_v59, %v402_v14  ;;  %vm342_vm5 = vweird.f32 %v778_v50 }
 0x11a   : > { %v370_v9 = vsub.f32 1.5, %v369_v2  ;;  %v389_v10 = vmul.f32 0.5, %v388_v3  ;;  %v410_v21 = vmul.f32 %v792_v59, %v400_v8  ;;  %vm493_vm12 = vcmask 519168  }
 0x11b   : > { %v625_v11 = vpop.eup %624  ;;  %v330_v12 = vsub.f32 1.5, %v329_v6  ;;  %v311_v13 = vadd.f32 1e-05, %v303_v7 }
 0x11c   : > { %v371_v15 = vmul.f32 %v619_v41, %v370_v9  ;;  %v390_v16 = vsub.f32 1.5, %v389_v10  ;;  %v317_v26 = vmul.f32 %v625_v11, %v772_v43  ;;  %v627_v19 = vpop.eup %626  ;;  %vm323_vm4 = vweird.f32 %v625_v11 }
 0x11d   : > { %v331_v33 = vmul.f32 %v774_v44, %v330_v12  ;;  %628 = vrsqrt.f32 %v311_v13  ;;  %v337_v25 = vmul.f32 %v627_v19, %v778_v50  ;;  %v420_v22 = vadd.f32 %v415_v18, %v410_v21  ;;  %vm324_vm6 = vmor %vm322_vm3, %vm323_vm4 }
 0x11e   : > { %v375_v20 = vsel %vm374_vm15, %v619_v41, %v371_v15  ;;  %v391_v32 = vmul.f32 %v623_v52, %v390_v16  ;;  %v318_v23 = vmul.f32 %v625_v11, %v317_v26  ;;  %vm343_vm7 = vweird.f32 %v627_v19 }
 0x11f   : > { %v401_v24 = vmul.f32 %v375_v20, %v708_v46  ;;  %v335_v27 = vsel %vm822_vm1, %v774_v44, %v331_v33  ;;  %v338_v34 = vmul.f32 %v627_v19, %v337_v25  ;;  %vm344_vm8 = vmor %vm342_vm5, %vm343_vm7  ;;  %vm352_vm10 = vweird.f32 %v311_v13 }
 0x120   : > { %v395_v28 = vsel %vm394_vm2, %v623_v52, %v391_v32  ;;  %v319_v29 = vmul.f32 0.5, %v318_v23  ;;  %v397_v37 = vmul.f32 %v335_v27, %v710_v47 }
 0x121   : > { %v403_v31 = vmul.f32 %v395_v28, %v706_v45  ;;  %v411_v35 = vmul.f32 %v792_v59, %v401_v24  ;;  %v339_v38 = vmul.f32 0.5, %v338_v34  ;;  %v422_v45 = vadd.f32 %v415_v18, %v412_v30 }
 0x122   : > { %v320_v46 = vsub.f32 1.5, %v319_v29  ;;  %v407_v55 = vmul.f32 %v792_v59, %v397_v37 }
 0x123   : > { %v629_v36 = vpop.eup %628  ;;  %v421_v39 = vadd.f32 %v415_v18, %v411_v35  ;;  %v413_v40 = vmul.f32 %v792_v59, %v403_v31  ;;  %v340_v44 = vsub.f32 1.5, %v339_v38 }
 0x124   : > { %v321_v41 = vmul.f32 %v625_v11, %v320_v46  ;;  %v347_v42 = vmul.f32 %v629_v36, %v311_v13  ;;  %vm353_vm9 = vweird.f32 %v629_v36  ;;  %v417_v0 = vadd.f32 %v415_v18, %v407_v55 }
 0x125   : > { %v426_v49 = vpack.c.bf16 %v421_v39, %v420_v22  ;;  %v423_v51 = vadd.f32 %v415_v18, %v413_v40  ;;  %v341_v54 = vmul.f32 %v627_v19, %v340_v44  ;;  %vm354_vm11 = vmor %vm352_vm10, %vm353_vm9 }
 0x126   : > { %v325_v43 = vsel %vm324_vm6, %v625_v11, %v321_v41  ;;  %v348_v52 = vmul.f32 %v629_v36, %v347_v42 }
 0x127   : > { %v396_v53 = vmul.f32 %v325_v43, %v712_v48  ;;  %573 = vmatmul.msk.bf16.vlgmr.msra.gmra.mxu2 %vm220_vm0, %v426_v49  ;;  %v427_v47 = vpack.c.bf16 %v423_v51, %v422_v45  ;;  %v345_v57 = vsel %vm344_vm8, %v627_v19, %v341_v54 }
 0x128   : > { %v349_v56 = vmul.f32 0.5, %v348_v52  ;;  %v398_v63 = vmul.f32 %v345_v57, %v727_v60 }
 0x129   : > { %574 = vmatmul.msk.bf16.vlgmr.msra.gmra.mxu3 %vm220_vm0, %v427_v47  ;;  %v406_v58 = vmul.f32 %v792_v59, %v396_v53 }
 0x12a   : > { %v350_v62 = vsub.f32 1.5, %v349_v56  ;;  %v408_v4 = vmul.f32 %v792_v59, %v398_v63 }
 0x12b   : > { %v416_v48 = vadd.f32 %v415_v18, %v406_v58 }
 0x12c   : > { %v351_v1 = vmul.f32 %v629_v36, %v350_v62  ;;  %v418_v6 = vadd.f32 %v415_v18, %v408_v4 }
 0x12d   : > { %v424_v2 = vpack.c.bf16 %v417_v0, %v416_v48 }
 0x12e   : > { %v355_v3 = vsel %vm354_vm11, %v629_v36, %v351_v1 }
 0x12f   : > { %v399_v50 = vmul.f32 %v355_v3, %v729_v61  ;;  %571 = vmatmul.msk.bf16.vlgmr.msra.gmra.mxu0 %vm220_vm0, %v424_v2 }
 0x131   : > { %v409_v5 = vmul.f32 %v792_v59, %v399_v50 }
 0x133   : > { %v419_v7 = vadd.f32 %v415_v18, %v409_v5 }
 0x135   : > { %v425_v8 = vpack.c.bf16 %v419_v7, %v418_v6 }
 0x137   : > { %572 = vmatmul.msk.bf16.vlgmr.msra.gmra.mxu1 %vm220_vm0, %v425_v8 }
 0x1aa   : > { %v475_v60 = vpop.f32.mrf.mxu2 }
 0x1ab   : > { %v489_v9 = vpack.c.bf16 %v475_v60, %v475_v60 }
 0x1ac   : > { %v480_v61 = vpop.f32.mrf.mxu3  ;;  %v465_v10 = vpop.f32.mrf.mxu0 }
 0x1ad   : > { %498 = vst.msk [vmem:[%s199_s6 + $0x10] sm:$0xf] %vm493_vm12, %v489_v9  ;;  %v491_v11 = vpack.c.bf16 %v480_v61, %v480_v61  ;;  %v485_v12 = vpack.c.bf16 %v465_v10, %v465_v10 }
 0x1af   : > { %500 = vst.msk [vmem:[%s199_s6 + $0x18] sm:$0xf] %vm493_vm12, %v491_v11 }
 0x1b0   : > { %494 = vst.msk [vmem:[%s199_s6] sm:$0xf] %vm493_vm12, %v485_v12 }
 0x1b2   : > { %v477_v59 = vpop.f32.mrf.mxu2 }
 0x1b3   : > { %v490_v13 = vpack.c.bf16 %v477_v59, %v477_v59 }
 0x1b4   : > { %v482_v14 = vpop.f32.mrf.mxu3  ;;  %v467_v15 = vpop.f32.mrf.mxu0 }
 0x1b5   : > { %499 = vst.msk [vmem:[%s199_s6 + $0x14] sm:$0xf] %vm493_vm12, %v490_v13  ;;  %v492_v16 = vpack.c.bf16 %v482_v14, %v482_v14  ;;  %v486_v26 = vpack.c.bf16 %v467_v15, %v467_v15  ;;  %v470_v33 = vpop.f32.mrf.mxu1 }
 0x1b6   : > { %v487_v17 = vpack.c.bf16 %v470_v33, %v470_v33 }
 0x1b7   : > { %501 = vst.msk [vmem:[%s199_s6 + $0x1c] sm:$0xf] %vm493_vm12, %v492_v16 }
 0x1b8   : > { %495 = vst.msk [vmem:[%s199_s6 + $0x4] sm:$0xf] %vm493_vm12, %v486_v26 }
 0x1b9   : > { %496 = vst.msk [vmem:[%s199_s6 + $0x8] sm:$0xf] %vm493_vm12, %v487_v17 }
 0x1bd   : > { %v472_v18 = vpop.f32.mrf.mxu1 }
 0x1be   : > { %v488_v19 = vpack.c.bf16 %v472_v18, %v472_v18 }
 0x1c0   : > { %497 = vst.msk [vmem:[%s199_s6 + $0xc] sm:$0xf] %vm493_vm12, %v488_v19 }
 0x1c1 PF: > { %s14_s15 = sadd.s32 1, %s636_s15  }
 0x1c2   : > { %p11_p4 = scmp.ge.s32.totalorder %s14_s15, 4  }
 0x1c4   :  { %13 = sbr.rel (!%p11_p4) target bundleno = 1 (0x1), region = 66 }

// kernel: perceiver_forward.9
= control target key start
LH: loop header
LB: loop body
LE: loop exit
PB: predicated region body
PF: predicated region fallthrough
CT: control target
= control target key end

     0   :  { %s1205_s29 = smov 0   ;;  %s1345_s0 = inlined_call_operand.vmem [shape: bf16[2,8,32], index: 0, kind: input, shape index: {}]   ;;  %s1346_s1 = inlined_call_operand.vmem [shape: bf16[1,32], index: 1, kind: input, shape index: {}]   ;;  %s1347_s2 = inlined_call_operand.vmem [shape: bf16[1,32], index: 2, kind: input, shape index: {}]   ;;  %s1348_s3 = inlined_call_operand.vmem [shape: bf16[32,32], index: 3, kind: input, shape index: {}]   ;;  %s1349_s4 = inlined_call_operand.vmem [shape: bf16[32,32], index: 4, kind: input, shape index: {}]   ;;  %s1350_s5 = inlined_call_operand.vmem [shape: bf16[32,32], index: 5, kind: input, shape index: {}]   ;;  %s1351_s6 = inlined_call_operand.vmem [shape: bf16[32,32], index: 6, kind: input, shape index: {}]   ;;  %s1352_s7 = inlined_call_operand.vmem [shape: bf16[1,32], index: 7, kind: input, shape index: {}]   ;;  %s1353_s8 = inlined_call_operand.vmem [shape: bf16[1,32], index: 8, kind: input, shape index: {}]   ;;  %s1354_s9 = inlined_call_operand.vmem [shape: bf16[1,32], index: 9, kind: input, shape index: {}]   ;;  %s1355_s10 = inlined_call_operand.vmem [shape: bf16[32,128], index: 10, kind: input, shape index: {}]   ;;  %s1356_s11 = inlined_call_operand.vmem [shape: bf16[1,128], index: 11, kind: input, shape index: {}]   ;;  %s1357_s12 = inlined_call_operand.vmem [shape: bf16[128,32], index: 12, kind: input, shape index: {}]   ;;  %s1358_s13 = inlined_call_operand.vmem [shape: bf16[1,32], index: 13, kind: input, shape index: {}]   ;;  %s1359_s14 = inlined_call_operand.vmem [shape: bf16[2,8,32], index: 14, kind: output, shape index: {}]  }
   0x1 LB: > { %s985_s30 = sadd.s32 4294967295, %s1126_s29   ;;  %p989_p0 = scmp.ge.s32.totalorder %s1126_s29, 1  ;;  %s1126_s29 = sphi %s1205_s29, %s24_s29  }
   0x2   : > { %p411_p1 = scmp.lt.s32.totalorder %s1126_s29, 3 }
   0x4   : > { %p412_p2 = pnand %p989_p0, %p411_p1 }
   0x5   : > { %p455_p3 = scmp.lt.s32.totalorder (!%p412_p2), %s985_s30, 1  ;;  %s1129_s22 = smov (!%p412_p2), 112  }
   0x6   : > { %415 = sbr.rel (%p412_p2) target bundleno = 1635 (0x663), region = 76 }
   0xb   : > { %s1361_s30 = smov (!%p455_p3, %s985_s30), 1  ;;  %vm468_vm0 = vcmask 261120   ;;  %v1128_v3 = vmov 32.0   ;;  %v1077_v15 = vld [vmem:[%s1348_s3 + $0x8] sm:$0xff]  ;;  %v1076_v18 = vld [vmem:[%s1348_s3] sm:$0xff]  ;;  %vm603_vm5 = vcmask 130048  }
   0xc   : > { %s990_s15 = sshll.u32 %s1361_s30, 2  ;;  %1104 = vrcp.f32 %v1128_v3  ;;  %v1079_v16 = vld [vmem:[%s1349_s4 + $0x8] sm:$0xff]  ;;  %530 = vmatpush.bf16.msra.mxu0 %v1077_v15  ;;  %v1078_v19 = vld [vmem:[%s1349_s4] sm:$0xff]  ;;  %vm637_vm6 = vcmask 1043456   ;;  %vm623_vm7 = vcmask 64512   ;;  %vm930_vm11 = vcmask 257024  }
   0xd   : > { %s458_s18 = scalar_lea.vmem %s1345_s0, %s990_s15  ;;  %v1081_v17 = vld [vmem:[%s1350_s5 + $0x8] sm:$0xff]  ;;  %561 = vmatpush.bf16.msra.mxu1 %v1079_v16  ;;  %v1080_v20 = vld [vmem:[%s1350_s5] sm:$0xff]  ;;  %s462_s20 = scalar_lea.vmem %s1359_s14, %s990_s15 }
   0xe   : > { %v464_v0 = vld [vmem:[%s458_s18] sm:$0xf]  ;;  %591 = vmatpush.bf16.msra.mxu3 %v1081_v17 }
   0xf   : > { %v1221_v1 = vunpack.c.l.bf16 %v464_v0  ;;  %v465_v27 = vld [vmem:[%s1346_s1] sm:$0x1] }
  0x10   : > { %531 = vmatpush.bf16.msra.mxu0 %v1076_v18  ;;  %v466_v29 = vld [vmem:[%s1347_s2] sm:$0x1]  ;;  %v498_v30 = vunpack.c.l.bf16 %v465_v27  ;;  %v1083_v27 = vld [vmem:[%s1351_s6 + $0x8] sm:$0xff] }
  0x11   : > { %v469_v2 = vsel %vm468_vm0, %v1221_v1, 0.0  ;;  %562 = vmatpush.bf16.msra.mxu1 %v1078_v19  ;;  %v501_v32 = vunpack.c.l.bf16 %v466_v29 }
  0x12   : > { %470 = vadd.xlane.f32.xlu0 %v469_v2  ;;  %v1105_v4 = vpop.eup %1104  ;;  %592 = vmatpush.bf16.msra.mxu3 %v1080_v20  ;;  %v499_v34 = vperm.slane %v498_v30, 0 }
  0x13   : > { %v473_v5 = vmul.f32 32.0, %v1105_v4  ;;  %vm477_vm1 = vweird.f32 %v1105_v4  ;;  %v502_v37 = vperm.slane %v501_v32, 0 }
  0x15   : > { %v474_v6 = vsub.f32 1.0, %v473_v5 }
  0x17   : > { %v475_v7 = vmul.f32 %v1105_v4, %v474_v6 }
  0x19   : > { %v476_v8 = vadd.f32 %v1105_v4, %v475_v7 }
  0x1b   : > { %v1225_v9 = vsel %vm477_vm1, %v1105_v4, %v476_v8 }
  0x85   : > { %v471_v10 = vpop.xlane.xlu0 %470 }
  0x86   : > { %v479_v11 = vmul.f32 %v1225_v9, %v471_v10 }
  0x88   : > { %v480_v12 = vsub.f32 %v1221_v1, %v479_v11 }
  0x8a   : > { %v481_v13 = vmul.f32 %v480_v12, %v480_v12 }
  0x8c   : > { %v482_v14 = vsel %vm468_vm0, %v481_v13, 0.0 }
  0x8d   : > { %483 = vadd.xlane.f32.xlu0 %v482_v14 }
 0x100   : > { %v484_v21 = vpop.xlane.xlu0 %483 }
 0x101   : > { %v485_v22 = vmul.f32 %v484_v21, %v1225_v9 }
 0x103   : > { %v486_v23 = vadd.f32 1e-05, %v485_v22 }
 0x105   : > { %1106 = vrsqrt.f32 %v486_v23  ;;  %vm493_vm3 = vweird.f32 %v486_v23 }
 0x10b   : > { %v1107_v24 = vpop.eup %1106 }
 0x10c   : > { %v488_v25 = vmul.f32 %v1107_v24, %v486_v23  ;;  %vm494_vm2 = vweird.f32 %v1107_v24 }
 0x10d   : > { %vm495_vm4 = vmor %vm493_vm3, %vm494_vm2 }
 0x10e   : > { %v489_v26 = vmul.f32 %v1107_v24, %v488_v25 }
 0x110   : > { %v490_v28 = vmul.f32 0.5, %v489_v26 }
 0x112   : > { %v491_v31 = vsub.f32 1.5, %v490_v28 }
 0x114   : > { %v492_v33 = vmul.f32 %v1107_v24, %v491_v31 }
 0x116   : > { %v496_v35 = vsel %vm495_vm4, %v1107_v24, %v492_v33 }
 0x117   : > { %v497_v36 = vmul.f32 %v496_v35, %v480_v12  ;;  %v1082_v12 = vld [vmem:[%s1351_s6] sm:$0xff] }
 0x119   : > { %v500_v38 = vmul.f32 %v499_v34, %v497_v36  ;;  %v768_v36 = vld [vmem:[%s1352_s7] sm:$0x1] }
 0x11b   : > { %v503_v39 = vadd.f32 %v502_v37, %v500_v38  ;;  %v769_v37 = vunpack.c.l.bf16 %v768_v36 }
 0x11d   : > { %v504_v40 = vpack.c.bf16 %v503_v39, %v503_v39 }
 0x11f   : > { %1000 = vmatmul.msk.bf16.vlgmr.msra.gmra.mxu0 %vm468_vm0, %v504_v40  ;;  %1009 = vmatmul.msk.bf16.vlgmr.msra.gmra.mxu1 %vm468_vm0, %v504_v40 }
 0x120   : > { %1018 = vmatmul.msk.bf16.vlgmr.msra.gmra.mxu3 %vm468_vm0, %v504_v40  ;;  %v770_v40 = vperm.slane %v769_v37, 0 }
 0x19c   : > { %v533_v41 = vpop.f32.mrf.mxu0  ;;  %v564_v42 = vpop.f32.mrf.mxu1 }
 0x19d   : > { %v537_v43 = vmul.f32 0.25, %v533_v41  ;;  %v568_v44 = vpack.c.bf16 %v564_v42, %v564_v42 }
 0x19f   : > { %v608_v45 = vsel %vm603_vm5, %v568_v44, 0  ;;  %v663_v46 = vunpack.c.l.b16 %v568_v44  ;;  %v538_v47 = vpack.c.bf16 %v537_v43, %v537_v43 }
 0x1a0   : > { %617 = vmatpush.bf16.xpose.msrb.mxu3 %v608_v45 }
 0x1a1   : > { %v664_v48 = vpack.c.b16 %v663_v46, %v663_v46  ;;  %v658_v53 = vunpack.c.l.b16 %v538_v47 }
 0x1a3   : > { %v594_v49 = vpop.f32.mrf.mxu3  ;;  %665 = vrot.lane.b32.xlu1 %v664_v48, %s1129_s22  ;;  %v659_v55 = vpack.c.b16 %v658_v53, %v658_v53 }
 0x1a4   : > { %v598_v50 = vpack.c.bf16 %v594_v49, %v594_v49  ;;  %v535_v51 = vpop.f32.mrf.mxu0  ;;  %v566_v52 = vpop.f32.mrf.mxu1 }
 0x1a5   : > { %v1093_v51 = vld [vmem:[%s1357_s12 + $0x38] sm:$0xff] }
 0x1a6   : > { %v639_v54 = vsel %vm637_vm6, %v598_v50, 0  ;;  %v697_v10 = vunpack.c.l.b16 %v598_v50  ;;  %v1084_v50 = vld [vmem:[%s1355_s10] sm:$0xff] }
 0x1a7   : > { %648 = vmatpush.bf16.msrb.mxu0 %v639_v54  ;;  %1019 = vmatmul.msk.bf16.vlgmr.msrb.gmra.mxu3 %vm603_vm5, %v538_v47 }
 0x1a8   : > { %v698_v11 = vpack.c.b16 %v697_v10, %v697_v10  ;;  %739 = vmatpush.bf16.msra.mxu3 %v1083_v27  ;;  %v1091_v10 = vld [vmem:[%s1357_s12 + $0x28] sm:$0xff] }
 0x1ab   : > { %v596_v56 = vpop.f32.mrf.mxu3  ;;  %660 = vrot.lane.b32.xlu1 %v659_v55, %s1129_s22  ;;  %761 = vmatpush.bf16.msra.mxu0 %v1082_v12  ;;  %v1089_v12 = vld [vmem:[%s1357_s12 + $0x18] sm:$0xff] }
 0x215   : > { %v666_v57 = vpop.permute.xlu1 %665 }
 0x216   : > { %v671_v58 = vsel %vm603_vm5, %v666_v57, 0  ;;  %v772_v57 = vld [vmem:[%s1353_s8] sm:$0x1] }
 0x217   : > { %680 = vmatpush.bf16.xpose.msrb.mxu1 %v671_v58 }
 0x21d   : > { %v661_v59 = vpop.permute.xlu1 %660 }
 0x21e   : > { %1021 = vmatmul.msk.bf16.vlgmr.msrb.gmra.mxu1 %vm603_vm5, %v661_v59 }
 0x22a   : > { %v619_v60 = vpop.f32.mrf.mxu3 }
 0x22b   : > { %v624_v61 = vsel %vm623_vm7, %v619_v60, -inf }
 0x22c   : > { %625 = vmax.xlane.f32.xlu0 %v624_v61  ;;  %v796_v61 = vunpack.c.l.bf16 %v772_v57 }
 0x232   : > { %v621_v62 = vpop.f32.mrf.mxu3 }
 0x29b   : > { %v682_v63 = vpop.f32.mrf.mxu1 }
 0x29c   : > { %v686_v0 = vsel %vm623_vm7, %v682_v63, -inf }
 0x29d   : > { %687 = vmax.xlane.f32.xlu2 %v686_v0  ;;  %v797_v0 = vperm.slane %v796_v61, 0 }
 0x29f   : > { %v626_v2 = vpop.xlane.xlu0 %625 }
 0x2a0   : > { %v627_v3 = vsub.f32 %v619_v60, %v626_v2  ;;  %v773_v60 = vld [vmem:[%s1354_s9] sm:$0x1] }
 0x2a2   : > { %v628_v4 = vmul.f32 1.442695, %v627_v3 }
 0x2a3   : > { %v684_v5 = vpop.f32.mrf.mxu1 }
 0x2a4   : > { %1108 = vpow2.f32 %v628_v4 }
 0x2aa   : > { %v1109_v6 = vpop.eup %1108 }
 0x2ab   : > { %v630_v7 = vsel %vm623_vm7, %v1109_v6, 0.0  ;;  %v633_v8 = vpack.c.bf16 %v1109_v6, %v1109_v6 }
 0x2ac   : > { %631 = vadd.xlane.f32.xlu0 %v630_v7 }
 0x2ad   : > { %1020 = vmatmul.msk.bf16.vlgmr.msrb.gmra.mxu0 %vm623_vm7, %v633_v8  ;;  %v1092_v8 = vld [vmem:[%s1357_s12 + $0x30] sm:$0xff] }
 0x2b5   : > { %699 = vrot.lane.b32.xlu2 %v698_v11, %s1129_s22  ;;  %v1090_v11 = vld [vmem:[%s1357_s12 + $0x20] sm:$0xff] }
 0x310   : > { %v688_v13 = vpop.xlane.xlu2 %687 }
 0x311   : > { %v689_v14 = vsub.f32 %v682_v63, %v688_v13  ;;  %v799_v63 = vunpack.c.l.bf16 %v773_v60  ;;  %v1088_v13 = vld [vmem:[%s1357_s12 + $0x10] sm:$0xff] }
 0x313   : > { %v690_v15 = vmul.f32 1.442695, %v689_v14  ;;  %v800_v4 = vperm.slane %v799_v63, 0  ;;  %v1087_v14 = vld [vmem:[%s1357_s12 + $0x8] sm:$0xff] }
 0x315   : > { %1110 = vpow2.f32 %v690_v15  ;;  %v807_v15 = vld [vmem:[%s1356_s11] sm:$0x1] }
 0x318   : > { %v700_v16 = vpop.permute.xlu2 %699 }
 0x319   : > { %v705_v17 = vsel %vm637_vm6, %v700_v16, 0  ;;  %v1086_v16 = vld [vmem:[%s1357_s12] sm:$0xff] }
 0x31a   : > { %714 = vmatpush.bf16.msra.mxu2 %v705_v17  ;;  %v808_v17 = vunpack.c.l.bf16 %v807_v15 }
 0x31b   : > { %v1111_v18 = vpop.eup %1110 }
 0x31c   : > { %v692_v19 = vsel %vm623_vm7, %v1111_v18, 0.0  ;;  %v695_v20 = vpack.c.bf16 %v1111_v18, %v1111_v18  ;;  %v809_v18 = vperm.slane %v808_v17, 0 }
 0x31d   : > { %693 = vadd.xlane.f32.xlu1 %v692_v19 }
 0x31e   : > { %1022 = vmatmul.msk.bf16.vlgmr.msra.gmra.mxu2 %vm623_vm7, %v695_v20 }
 0x31f   : > { %v632_v21 = vpop.xlane.xlu0 %631  ;;  %915 = vmatpush.bf16.msrb.mxu2 %v1093_v51 }
 0x320   : > { %1112 = vrcp.f32 %v632_v21 }
 0x323   : > { %916 = vmatpush.bf16.msrb.mxu2 %v1092_v8 }
 0x326   : > { %v1113_v22 = vpop.eup %1112 }
 0x327   : > { %917 = vmatpush.bf16.msrb.mxu2 %v1091_v10 }
 0x32a   : > { %v650_v23 = vpop.f32.mrf.mxu0 }
 0x32b   : > { %v655_v24 = vmul.f32 %v1113_v22, %v650_v23  ;;  %918 = vmatpush.bf16.msrb.mxu2 %v1090_v11 }
 0x32d   : > { %v656_v25 = vpack.c.bf16 %v655_v24, %v655_v24 }
 0x32f   : > { %1032 = vmatmul.msk.bf16.vlgmr.msra.gmra.mxu0 %vm603_vm5, %v656_v25  ;;  %919 = vmatpush.bf16.msrb.mxu2 %v1089_v12 }
 0x332   : > { %v652_v26 = vpop.f32.mrf.mxu0 }
 0x333   : > { %920 = vmatpush.bf16.msrb.mxu2 %v1088_v13 }
 0x337   : > { %921 = vmatpush.bf16.msrb.mxu2 %v1087_v14 }
 0x33b   : > { %922 = vmatpush.bf16.msrb.mxu2 %v1086_v16 }
 0x390   : > { %v694_v28 = vpop.xlane.xlu1 %693 }
 0x391   : > { %1114 = vrcp.f32 %v694_v28 }
 0x397   : > { %v1115_v29 = vpop.eup %1114 }
 0x3a1   : > { %v716_v30 = vpop.f32.mrf.mxu2 }
 0x3a2   : > { %v721_v31 = vmul.f32 %v1115_v29, %v716_v30 }
 0x3a4   : > { %v722_v32 = vpack.c.bf16 %v721_v31, %v721_v31 }
 0x3a6   : > { %1027 = vmatmul.msk.bf16.vlgmr.msra.gmra.mxu3 %vm603_vm5, %v722_v32  ;;  %v864_v32 = vld [vmem:[%s1358_s13] sm:$0x1] }
 0x3a9   : > { %v718_v33 = vpop.f32.mrf.mxu2 }
 0x3aa   : > { %v865_v33 = vunpack.c.l.bf16 %v864_v32 }
 0x3ac   : > { %v763_v34 = vpop.f32.mrf.mxu0 }
 0x3b4   : > { %v765_v35 = vpop.f32.mrf.mxu0 }
 0x429   : > { %v741_v38 = vpop.f32.mrf.mxu3 }
 0x42a   : > { %v764_v39 = vadd.f32 %v763_v34, %v741_v38  ;;  %v866_v34 = vperm.slane %v865_v33, 0 }
 0x42c   : > { %v767_v41 = vadd.f32 %v764_v39, %v1221_v1  ;;  %v1085_v1 = vld [vmem:[%s1355_s10 + $0x8] sm:$0xff] }
 0x42d   : > { %831 = vmatpush.bf16.msra.mxu1 %v1085_v1 }
 0x42e   : > { %v1285_v42 = vadd.f32 %v770_v40, %v767_v41 }
 0x430   : > { %v774_v43 = vsel %vm468_vm0, %v1285_v42, 0.0 }
 0x431   : > { %v743_v44 = vpop.f32.mrf.mxu3  ;;  %775 = vadd.xlane.f32.xlu0 %v774_v43  ;;  %832 = vmatpush.bf16.msra.mxu1 %v1084_v50 }
 0x4a4   : > { %v776_v45 = vpop.xlane.xlu0 %775 }
 0x4a5   : > { %v777_v46 = vmul.f32 %v776_v45, %v1225_v9 }
 0x4a7   : > { %v778_v47 = vsub.f32 %v1285_v42, %v777_v46 }
 0x4a9   : > { %v779_v48 = vmul.f32 %v778_v47, %v778_v47 }
 0x4ab   : > { %v780_v49 = vsel %vm468_vm0, %v779_v48, 0.0 }
 0x4ac   : > { %781 = vadd.xlane.f32.xlu2 %v780_v49 }
 0x51f   : > { %v782_v52 = vpop.xlane.xlu2 %781 }
 0x520   : > { %v783_v53 = vmul.f32 %v782_v52, %v1225_v9 }
 0x522   : > { %v784_v54 = vadd.f32 1e-05, %v783_v53 }
 0x524   : > { %1116 = vrsqrt.f32 %v784_v54  ;;  %vm791_vm9 = vweird.f32 %v784_v54 }
 0x52a   : > { %v1117_v55 = vpop.eup %1116 }
 0x52b   : > { %v786_v56 = vmul.f32 %v1117_v55, %v784_v54  ;;  %vm792_vm8 = vweird.f32 %v1117_v55 }
 0x52c   : > { %vm793_vm10 = vmor %vm791_vm9, %vm792_vm8 }
 0x52d   : > { %v787_v58 = vmul.f32 %v1117_v55, %v786_v56 }
 0x52f   : > { %v788_v59 = vmul.f32 0.5, %v787_v58 }
 0x531   : > { %v789_v62 = vsub.f32 1.5, %v788_v59 }
 0x533   : > { %v790_v9 = vmul.f32 %v1117_v55, %v789_v62 }
 0x535   : > { %v794_v2 = vsel %vm793_vm10, %v1117_v55, %v790_v9 }
 0x536   : > { %v795_v3 = vmul.f32 %v794_v2, %v778_v47 }
 0x538   : > { %v798_v5 = vmul.f32 %v797_v0, %v795_v3 }
 0x53a   : > { %v801_v6 = vadd.f32 %v800_v4, %v798_v5 }
 0x53c   : > { %v802_v7 = vpack.c.bf16 %v801_v6, %v801_v6 }
 0x53e   : > { %1041 = vmatmul.msk.bf16.vlgmr.msra.gmra.mxu1 %vm468_vm0, %v802_v7 }
 0x5bb   : > { %v834_v19 = vpop.f32.mrf.mxu1 }
 0x5bc   : > { %v835_v20 = vadd.f32 %v834_v19, %v809_v18 }
 0x5be   : > { %v838_v21 = vmul.f32 %v835_v20, %v835_v20 }
 0x5c0   : > { %v839_v22 = vmul.f32 %v838_v21, %v835_v20 }
 0x5c2   : > { %v840_v23 = vmul.f32 0.044715, %v839_v22 }
 0x5c3   : > { %v836_v24 = vpop.f32.mrf.mxu1 }
 0x5c4   : > { %v841_v25 = vadd.f32 %v840_v23, %v835_v20 }
 0x5c6   : > { %v842_v26 = vmul.f32 0.7978846, %v841_v25 }
 0x5c8   : > { %1118 = vtanh.f32 %v842_v26 }
 0x5ce   : > { %v1119_v27 = vpop.eup %1118 }
 0x5cf   : > { %v844_v28 = vadd.f32 1.0, %v1119_v27 }
 0x5d1   : > { %v845_v29 = vmul.f32 0.5, %v844_v28 }
 0x5d3   : > { %v846_v30 = vmul.f32 %v845_v29, %v835_v20 }
 0x5d5   : > { %v847_v31 = vpack.c.bf16 %v846_v30, %v846_v30 }
 0x5d7   : > { %923 = vmatmul.bf16.vlgmr.msrb.gmra.mxu2 %v847_v31 }
 0x65a   : > { %v924_v35 = vpop.f32.mrf.mxu2 }
 0x65b   : > { %v925_v36 = vadd.f32 %v924_v35, %v866_v34 }
 0x65d   : > { %v928_v37 = vadd.f32 %v925_v36, %v1285_v42 }
 0x65f   : > { %v929_v38 = vpack.c.bf16 %v928_v37, %v928_v37 }
 0x661   : > { %931 = vst.msk [vmem:[%s462_s20] sm:$0xf] %vm930_vm11, %v929_v38 }
 0x662   : > { %v926_v39 = vpop.f32.mrf.mxu2 }
 0x663 PF: > { %s24_s29 = sadd.s32 1, %s1126_s29  }
 0x664   : > { %p21_p4 = scmp.ge.s32.totalorder %s24_s29, 4  }
 0x666   :  { %23 = sbr.rel (!%p21_p4) target bundleno = 1 (0x1), region = 106 }

// kernel: perceiver_forward.8
= control target key start
LH: loop header
LB: loop body
LE: loop exit
PB: predicated region body
PF: predicated region fallthrough
CT: control target
= control target key end

     0   :  { %s1390_s25 = smov 0   ;;  %s1392_s26 = smov 0   ;;  %s1575_s0 = inlined_call_operand.vmem [shape: bf16[2,8,32], index: 0, kind: input, shape index: {}]   ;;  %s1576_s1 = inlined_call_operand.vmem [shape: bf16[2,64,64], index: 1, kind: input, shape index: {}]   ;;  %s1577_s2 = inlined_call_operand.vmem [shape: bf16[1,32], index: 2, kind: input, shape index: {}]   ;;  %s1578_s3 = inlined_call_operand.vmem [shape: bf16[1,32], index: 3, kind: input, shape index: {}]   ;;  %s1579_s4 = inlined_call_operand.vmem [shape: bf16[32,32], index: 4, kind: input, shape index: {}]   ;;  %s1580_s5 = inlined_call_operand.vmem [shape: bf16[32,32], index: 5, kind: input, shape index: {}]   ;;  %s1581_s6 = inlined_call_operand.vmem [shape: bf16[1,32], index: 6, kind: input, shape index: {}]   ;;  %s1582_s7 = inlined_call_operand.vmem [shape: bf16[1,32], index: 7, kind: input, shape index: {}]   ;;  %s1583_s8 = inlined_call_operand.vmem [shape: bf16[1,32], index: 8, kind: input, shape index: {}]   ;;  %s1584_s9 = inlined_call_operand.vmem [shape: bf16[32,128], index: 9, kind: input, shape index: {}]   ;;  %s1585_s10 = inlined_call_operand.vmem [shape: bf16[1,128], index: 10, kind: input, shape index: {}]   ;;  %s1586_s11 = inlined_call_operand.vmem [shape: bf16[128,32], index: 11, kind: input, shape index: {}]   ;;  %s1587_s12 = inlined_call_operand.vmem [shape: bf16[1,32], index: 12, kind: input, shape index: {}]   ;;  %s1588_s13 = inlined_call_operand.vmem [shape: bf16[2,8,32], index: 13, kind: output, shape index: {}]  }
   0x1   :  { %s1394_s27 = smov 0  }
   0x2 LB: > { %s35_s28 = sadd.s32 1, %s1307_s26  ;;  %p1129_p0 = scmp.ge.s32.totalorder %s1311_s27, 1  ;;  %s1311_s27 = sphi %s1394_s27, %s23_s27   ;;  %s1307_s26 = sphi %s1392_s26, %s1590_s26   ;;  %s1303_s25 = sphi %s1390_s25, %s1589_s25  }
   0x3   : > { %p37_p1 = scmp.ge.s32.totalorder %s35_s28, 2  ;;  %p415_p2 = scmp.lt.s32.totalorder %s1311_s27, 3 }
   0x5   : > { %s1592_s28 = smov (%p37_p1, %s35_s28), 0  ;;  %p416_p3 = pnand %p1129_p0, %p415_p2 }
   0x6   : > { %p466_p4 = scmp.lt.s32.totalorder (!%p416_p3), %s1303_s25, 1  ;;  %s1314_s16 = smov (!%p416_p3), 96  }
   0x7   : > { %419 = sbr.rel (%p416_p3) target bundleno = 2120 (0x848), region = 72  ;;  %s1315_s17 = smov (!%p416_p3), 112  }
   0x8   : > { %s1317_s18 = smov (!%p416_p3), 80  }
   0xc   : > { %s1594_s25 = smov (!%p466_p4, %s1303_s25), 1  ;;  %vm493_vm0 = vcmask 261120   ;;  %v1313_v3 = vmov 32.0   ;;  %v1218_v15 = vld [vmem:[%s1579_s4 + $0x8] sm:$0xff]  ;;  %v1217_v16 = vld [vmem:[%s1579_s4] sm:$0xff]  ;;  %vm569_vm2 = vcmask 130048  }
   0xd   : > { %s1130_s29 = sshll.u32 %s1594_s25, 2  ;;  %1269 = vrcp.f32 %v1313_v3  ;;  %555 = vmatpush.bf16.msra.mxu0 %v1218_v15  ;;  %s1216_s20 = sshll.u32 %s1594_s25, 5  ;;  %v490_v28 = vld [vmem:[%s1577_s2] sm:$0x1]  ;;  %vm564_vm6 = vcmask 7168   ;;  %vm632_vm7 = vcmask 523264  }
   0xe   : > { %s469_s15 = scalar_lea.vmem %s1575_s0, %s1130_s29  ;;  %s1435_s23 = scalar_lea.vmem %s1576_s1, %s1216_s20  ;;  %v491_v31 = vld [vmem:[%s1578_s3] sm:$0x1]  ;;  %v523_v32 = vunpack.c.l.bf16 %v490_v28  ;;  %v1316_v50 = vmov -1e+30   ;;  %v1318_v54 = vmov 0   ;;  %v1319_v55 = vmov 0.0  }
   0xf   : > { %v485_v0 = vld [vmem:[%s469_s15] sm:$0xf]  ;;  %v1222_v17 = vld [vmem:[%s1435_s23 + $0x18] sm:$0xff]  ;;  %v1221_v22 = vld [vmem:[%s1435_s23 + $0x10] sm:$0xff]  ;;  %v526_v34 = vunpack.c.l.bf16 %v491_v31  ;;  %565 = vst.msk [vmem:[#allocation3] sm:$0xff] %vm564_vm6, %v1316_v50  ;;  %1266 = vset.pattern.permute.xlu2 %v1318_v54  ;;  %1268 = vset.pattern.permute.xlu0 %v1318_v54  ;;  %s483_s19 = scalar_lea.vmem %s1588_s13, %s1130_s29  ;;  %vm1044_vm11 = vcmask 257024  }
  0x10   : > { %v1416_v1 = vunpack.c.l.bf16 %v485_v0  ;;  %v616_v20 = vsel %vm569_vm2, %v1222_v17, 0  ;;  %v613_v23 = vsel %vm569_vm2, %v1221_v22, 0  ;;  %v1443_v25 = vld [vmem:[%s1435_s23 + $0x8] sm:$0xff]  ;;  %v524_v36 = vperm.slane %v523_v32, 0  ;;  %v1219_v43 = vld [vmem:[%s1435_s23] sm:$0xff]  ;;  %670 = vrot.lane.b32.xlu2 %v1222_v17, %s1314_s16  ;;  %566 = vst.msk [vmem:[#allocation3 + $0x8] sm:$0xff] %vm564_vm6, %v1316_v50  ;;  %1267 = vset.pattern.permute.xlu1 %v1318_v54 }
  0x11   : > { %556 = vmatpush.bf16.msra.mxu0 %v1217_v16  ;;  %622 = vmatpush.bf16.xpose.msra.mxu1 %v616_v20  ;;  %v610_v29 = vsel %vm569_vm2, %v1443_v25, 0  ;;  %v527_v39 = vperm.slane %v526_v34, 0  ;;  %v607_v44 = vsel %vm569_vm2, %v1219_v43, 0  ;;  %567 = vst.msk [vmem:[#allocation4] sm:$0xff] %vm564_vm6, %v1319_v55 }
  0x12   : > { %v494_v2 = vsel %vm493_vm0, %v1416_v1, 0.0  ;;  %571 = vst.msk [vmem:[#allocation5 + $0x8] sm:$0xff] %vm569_vm2, %v1319_v55 }
  0x13   : > { %495 = vadd.xlane.f32.xlu0 %v494_v2  ;;  %v1270_v4 = vpop.eup %1269  ;;  %568 = vst.msk [vmem:[#allocation4 + $0x8] sm:$0xff] %vm564_vm6, %v1319_v55 }
  0x14   : > { %v498_v5 = vmul.f32 32.0, %v1270_v4  ;;  %vm502_vm1 = vweird.f32 %v1270_v4  ;;  %570 = vst.msk [vmem:[#allocation5] sm:$0xff] %vm569_vm2, %v1319_v55 }
  0x16   : > { %v499_v6 = vsub.f32 1.0, %v498_v5  ;;  %v631_v57 = vld [vmem:[#allocation3] sm:$0xff] }
  0x18   : > { %v500_v7 = vmul.f32 %v1270_v4, %v499_v6  ;;  %704 = vrot.lane.b32.xlu2 %v1221_v22, %s1315_s17 }
  0x19   : > { %623 = vmatpush.bf16.xpose.msra.mxu1 %v613_v23  ;;  %v762_v55 = vld [vmem:[#allocation5 + $0x8] sm:$0xff] }
  0x1a   : > { %v501_v8 = vadd.f32 %v1270_v4, %v500_v7 }
  0x1c   : > { %v1420_v9 = vsel %vm502_vm1, %v1270_v4, %v501_v8 }
  0x21   : > { %624 = vmatpush.bf16.xpose.msra.mxu1 %v610_v29 }
  0x29   : > { %625 = vmatpush.bf16.xpose.msra.mxu1 %v607_v44 }
  0x6a   : > { %v671_v56 = vpop.permute.xlu2 %670 }
  0x6b   : > { %683 = vmatpush.bf16.msra.mxu3 %v671_v56 }
  0x72   : > { %v705_v0 = vpop.permute.xlu2 %704 }
  0x73   : > { %v718_v15 = vsel %vm569_vm2, %v705_v0, 0 }
  0x86   : > { %v496_v10 = vpop.xlane.xlu0 %495 }
  0x87   : > { %v504_v11 = vmul.f32 %v1420_v9, %v496_v10 }
  0x89   : > { %v505_v12 = vsub.f32 %v1416_v1, %v504_v11 }
  0x8b   : > { %v506_v13 = vmul.f32 %v505_v12, %v505_v12 }
  0x8d   : > { %v507_v14 = vsel %vm493_vm0, %v506_v13, 0.0 }
  0x8e   : > { %508 = vadd.xlane.f32.xlu0 %v507_v14 }
  0xa2   : > { %668 = vrot.lane.b32.xlu0 %v1221_v22, %s1314_s16 }
  0xaa   : > { %700 = vrot.lane.b32.xlu0 %v1219_v43, %s1315_s17 }
  0xb2   : > { %776 = vrot.lane.b32.xlu0 %v1222_v17, %s1317_s18 }
  0xba   : > { %774 = vrot.lane.b32.xlu0 %v1221_v22, %s1317_s18 }
  0xc2   : > { %770 = vrot.lane.b32.xlu0 %v1219_v43, %s1317_s18 }
 0x101   : > { %v509_v18 = vpop.xlane.xlu0 %508 }
 0x102   : > { %v510_v19 = vmul.f32 %v509_v18, %v1420_v9 }
 0x104   : > { %v511_v21 = vadd.f32 1e-05, %v510_v19 }
 0x106   : > { %1271 = vrsqrt.f32 %v511_v21  ;;  %vm518_vm4 = vweird.f32 %v511_v21 }
 0x10c   : > { %v1272_v24 = vpop.eup %1271 }
 0x10d   : > { %v513_v26 = vmul.f32 %v1272_v24, %v511_v21  ;;  %vm519_vm3 = vweird.f32 %v1272_v24 }
 0x10e   : > { %vm520_vm5 = vmor %vm518_vm4, %vm519_vm3 }
 0x10f   : > { %v514_v27 = vmul.f32 %v1272_v24, %v513_v26 }
 0x111   : > { %v515_v30 = vmul.f32 0.5, %v514_v27 }
 0x113   : > { %v516_v33 = vsub.f32 1.5, %v515_v30 }
 0x114   : > { %v669_v63 = vpop.permute.xlu0 %668 }
 0x115   : > { %v517_v35 = vmul.f32 %v1272_v24, %v516_v33  ;;  %684 = vmatpush.bf16.msra.mxu3 %v669_v63 }
 0x117   : > { %v521_v37 = vsel %vm520_vm5, %v1272_v24, %v517_v35  ;;  %v648_v24 = vld [vmem:[#allocation4] sm:$0xff] }
 0x118   : > { %v522_v38 = vmul.f32 %v521_v37, %v505_v12 }
 0x11a   : > { %v525_v40 = vmul.f32 %v524_v36, %v522_v38  ;;  %v737_v36 = vld [vmem:[#allocation3 + $0x8] sm:$0xff] }
 0x11c   : > { %v528_v41 = vadd.f32 %v527_v39, %v525_v40  ;;  %v701_v6 = vpop.permute.xlu0 %700 }
 0x11d   : > { %v712_v19 = vsel %vm569_vm2, %v701_v6, 0  ;;  %v1224_v6 = vld [vmem:[%s1580_s5 + $0x8] sm:$0xff] }
 0x11e   : > { %v529_v42 = vpack.c.bf16 %v528_v41, %v528_v41  ;;  %844 = vmatpush.bf16.msra.mxu2 %v1224_v6 }
 0x120   : > { %1142 = vmatmul.msk.bf16.vlgmr.msra.gmra.mxu0 %vm493_vm0, %v529_v42 }
 0x124   : > { %v777_v13 = vpop.permute.xlu0 %776 }
 0x125   : > { %789 = vmatpush.bf16.msrb.mxu0 %v777_v13 }
 0x12c   : > { %v775_v16 = vpop.permute.xlu0 %774 }
 0x12d   : > { %790 = vmatpush.bf16.msrb.mxu0 %v775_v16 }
 0x134   : > { %v771_v22 = vpop.permute.xlu0 %770 }
 0x19d   : > { %v558_v45 = vpop.f32.mrf.mxu0 }
 0x19e   : > { %v562_v46 = vmul.f32 0.25, %v558_v45 }
 0x1a0   : > { %563 = vst.msk [vmem:[#allocation2] sm:$0xff] %vm493_vm0, %v562_v46 }
 0x1a5   : > { %v560_v47 = vpop.f32.mrf.mxu0 }
 0x1a7   : > { %v580_v48 = vld [vmem:[#allocation2] sm:$0xff] }
 0x1a8   : > { %v581_v49 = vpack.c.bf16 %v580_v48, %v580_v48 }
 0x1aa   : > { %1159 = vmatmul.msk.bf16.vlgmr.msra.gmra.mxu1 %vm569_vm2, %v581_v49  ;;  %v696_v61 = vunpack.c.l.b16 %v581_v49  ;;  %v754_v49 = vld [vmem:[#allocation4 + $0x8] sm:$0xff] }
 0x1ac   : > { %v697_v62 = vpack.c.b16 %v696_v61, %v696_v61 }
 0x227   : > { %v627_v51 = vpop.f32.mrf.mxu1 }
 0x228   : > { %v633_v52 = vsel %vm632_vm7, %v627_v51, -inf }
 0x229   : > { %634 = vmax.xlane.f32.xlu1 %v633_v52 }
 0x22f   : > { %v629_v53 = vpop.f32.mrf.mxu1 }
 0x230   : > { %v656_v53 = vld [vmem:[#allocation5] sm:$0xff] }
 0x242   : > { %706 = vrot.lane.b32.xlu1 %v1222_v17, %s1315_s17 }
 0x24a   : > { %702 = vrot.lane.b32.xlu1 %v1443_v25, %s1315_s17 }
 0x29c   : > { %v635_v58 = vpop.xlane.xlu1 %634 }
 0x29d   : > { %v636_v59 = vmax.f32 %v631_v57, %v635_v58 }
 0x29f   : > { %v637_v60 = vsub.f32 %v631_v57, %v636_v59  ;;  %694 = vst.msk [vmem:[#allocation3] sm:$0xff] %vm564_vm6, %v636_v59  ;;  %642 = vperm.xlu2 %1266, %v636_v59  }
 0x2a1   : > { %v638_v21 = vmul.f32 1.442695, %v637_v60 }
 0x2a7   : > { %666 = vrot.lane.b32.xlu2 %v1443_v25, %s1314_s16 }
 0x2af   : > { %664 = vrot.lane.b32.xlu2 %v1219_v43, %s1314_s16 }
 0x2b4   : > { %v707_v10 = vpop.permute.xlu1 %706 }
 0x2b5   : > { %v721_v11 = vsel %vm569_vm2, %v707_v10, 0 }
 0x2b7   : > { %698 = vrot.lane.b32.xlu2 %v697_v62, %s1315_s17 }
 0x2bc   : > { %v703_v17 = vpop.permute.xlu1 %702 }
 0x2bd   : > { %v715_v18 = vsel %vm569_vm2, %v703_v17, 0 }
 0x2f9   : > { %v643_v2 = vpop.permute.xlu2 %642 }
 0x2fa   : > { %v645_v3 = vsub.f32 %v627_v51, %v643_v2 }
 0x2fc   : > { %v646_v4 = vmul.f32 1.442695, %v645_v3 }
 0x2fe   : > { %1273 = vpow2.f32 %v646_v4 }
 0x2ff   : > { %1275 = vpow2.f32 %v638_v21 }
 0x301   : > { %v667_v5 = vpop.permute.xlu2 %666 }
 0x302   : > { %685 = vmatpush.bf16.msra.mxu3 %v667_v5 }
 0x304   : > { %v1274_v7 = vpop.eup %1273 }
 0x305   : > { %v650_v8 = vsel %vm632_vm7, %v1274_v7, 0.0  ;;  %v663_v14 = vpack.c.bf16 %v1274_v7, %v1274_v7  ;;  %v1276_v23 = vpop.eup %1275 }
 0x306   : > { %651 = vadd.xlane.f32.xlu0 %v650_v8  ;;  %v649_v26 = vmul.f32 %v1276_v23, %v648_v24 }
 0x309   : > { %v665_v12 = vpop.permute.xlu2 %664 }
 0x30a   : > { %686 = vmatpush.bf16.msra.mxu3 %v665_v12 }
 0x30d   : > { %1160 = vmatmul.msk.bf16.vlgmr.msra.gmra.mxu3 %vm632_vm7, %v663_v14  ;;  %v874_v14 = vld [vmem:[%s1581_s6] sm:$0x1] }
 0x30e   : > { %727 = vmatpush.bf16.xpose.msrb.mxu3 %v721_v11 }
 0x311   : > { %v699_v20 = vpop.permute.xlu2 %698 }
 0x316   : > { %728 = vmatpush.bf16.xpose.msrb.mxu3 %v718_v15  ;;  %v875_v15 = vunpack.c.l.bf16 %v874_v14 }
 0x31e   : > { %729 = vmatpush.bf16.xpose.msrb.mxu3 %v715_v18  ;;  %v876_v18 = vperm.slane %v875_v15, 0 }
 0x326   : > { %730 = vmatpush.bf16.xpose.msrb.mxu3 %v712_v19 }
 0x32d   : > { %1161 = vmatmul.msk.bf16.vlgmr.msrb.gmra.mxu3 %vm569_vm2, %v699_v20 }
 0x379   : > { %v652_v27 = vpop.xlane.xlu0 %651 }
 0x37a   : > { %v653_v28 = vadd.f32 %v652_v27, %v649_v26 }
 0x37c   : > { %655 = vst.msk [vmem:[#allocation4] sm:$0xff] %vm564_vm6, %v653_v28 }
 0x383   : > { %v809_v29 = vld [vmem:[#allocation4] sm:$0xff] }
 0x384   : > { %1277 = vrcp.f32 %v809_v29  ;;  %v1225_v29 = vld [vmem:[%s1584_s9] sm:$0xff] }
 0x38a   : > { %v1278_v30 = vpop.eup %1277 }
 0x38b   : > { %813 = vperm.xlu0 %1268, %v1278_v30   ;;  %v1234_v30 = vld [vmem:[%s1586_s11 + $0x38] sm:$0xff] }
 0x38c   : > { %1029 = vmatpush.bf16.msrb.mxu2 %v1234_v30 }
 0x390   : > { %v688_v31 = vpop.f32.mrf.mxu3 }
 0x398   : > { %v690_v32 = vpop.f32.mrf.mxu3 }
 0x3b0   : > { %v732_v33 = vpop.f32.mrf.mxu3 }
 0x3b1   : > { %v738_v34 = vsel %vm632_vm7, %v732_v33, -inf }
 0x3b2   : > { %739 = vmax.xlane.f32.xlu1 %v738_v34 }
 0x3b8   : > { %v734_v35 = vpop.f32.mrf.mxu3 }
 0x3fd   : > { %v814_v0 = vpop.permute.xlu0 %813 }
 0x425   : > { %v740_v37 = vpop.xlane.xlu1 %739 }
 0x426   : > { %v741_v38 = vmax.f32 %v737_v36, %v740_v37  ;;  %v878_v37 = vld [vmem:[%s1582_s7] sm:$0x1] }
 0x428   : > { %v742_v39 = vsub.f32 %v737_v36, %v741_v38  ;;  %800 = vst.msk [vmem:[#allocation3 + $0x8] sm:$0xff] %vm564_vm6, %v741_v38  ;;  %747 = vperm.xlu2 %1266, %v741_v38  }
 0x42a   : > { %v743_v40 = vmul.f32 1.442695, %v742_v39  ;;  %v879_v39 = vld [vmem:[%s1583_s8] sm:$0x1] }
 0x42c   : > { %1279 = vpow2.f32 %v743_v40  ;;  %v910_v40 = vunpack.c.l.bf16 %v878_v37 }
 0x430   : > { %772 = vrot.lane.b32.xlu2 %v1443_v25, %s1317_s18  ;;  %v1223_v25 = vld [vmem:[%s1580_s5] sm:$0xff] }
 0x432   : > { %v1280_v41 = vpop.eup %1279 }
 0x433   : > { %765 = vperm.xlu1 %1267, %v1280_v41   ;;  %v755_v50 = vmul.f32 %v1280_v41, %v754_v49  ;;  %v1233_v49 = vld [vmem:[%s1586_s11 + $0x30] sm:$0xff] }
 0x434   : > { %1030 = vmatpush.bf16.msrb.mxu2 %v1233_v49 }
 0x482   : > { %v748_v42 = vpop.permute.xlu2 %747 }
 0x483   : > { %v750_v43 = vsub.f32 %v732_v33, %v748_v42  ;;  %v913_v42 = vunpack.c.l.bf16 %v879_v39 }
 0x485   : > { %v751_v44 = vmul.f32 1.442695, %v750_v43  ;;  %v911_v43 = vperm.slane %v910_v40, 0 }
 0x487   : > { %1281 = vpow2.f32 %v751_v44 }
 0x48a   : > { %v773_v45 = vpop.permute.xlu2 %772 }
 0x48b   : > { %791 = vmatpush.bf16.msrb.mxu0 %v773_v45 }
 0x48d   : > { %v1282_v46 = vpop.eup %1281 }
 0x48e   : > { %v756_v47 = vsel %vm632_vm7, %v1282_v46, 0.0  ;;  %v769_v48 = vpack.c.bf16 %v1282_v46, %v1282_v46  ;;  %v914_v46 = vperm.slane %v913_v42, 0 }
 0x48f   : > { %757 = vadd.xlane.f32.xlu2 %v756_v47  ;;  %792 = vmatpush.bf16.msrb.mxu0 %v771_v22 }
 0x492   : > { %1162 = vmatmul.msk.bf16.vlgmr.msrb.gmra.mxu0 %vm632_vm7, %v769_v48 }
 0x493   : > { %866 = vmatpush.bf16.msra.mxu0 %v1223_v25 }
 0x4a5   : > { %v766_v56 = vpop.permute.xlu1 %765 }
 0x4a6   : > { %v768_v60 = vmul.f32 %v766_v56, %v762_v55  ;;  %v1227_v55 = vld [vmem:[%s1586_s11] sm:$0xff] }
 0x4a7   : > { %659 = vperm.xlu2 %1266, %v1276_v23   ;;  %v921_v56 = vld [vmem:[%s1585_s10] sm:$0x1] }
 0x502   : > { %v758_v51 = vpop.xlane.xlu2 %757 }
 0x503   : > { %v759_v52 = vadd.f32 %v758_v51, %v755_v50  ;;  %v1232_v50 = vld [vmem:[%s1586_s11 + $0x28] sm:$0xff]  ;;  %v1231_v51 = vld [vmem:[%s1586_s11 + $0x20] sm:$0xff] }
 0x504   : > { %1031 = vmatpush.bf16.msrb.mxu2 %v1232_v50 }
 0x505   : > { %760 = vst.msk [vmem:[#allocation4 + $0x8] sm:$0xff] %vm564_vm6, %v759_v52  ;;  %v1230_v52 = vld [vmem:[%s1586_s11 + $0x18] sm:$0xff] }
 0x508   : > { %1032 = vmatpush.bf16.msrb.mxu2 %v1231_v51 }
 0x50a   : > { %v660_v54 = vpop.permute.xlu2 %659 }
 0x50b   : > { %v662_v57 = vmul.f32 %v660_v54, %v656_v53  ;;  %v1229_v53 = vld [vmem:[%s1586_s11 + $0x10] sm:$0xff]  ;;  %v1228_v54 = vld [vmem:[%s1586_s11 + $0x8] sm:$0xff] }
 0x50c   : > { %v819_v58 = vld [vmem:[#allocation4 + $0x8] sm:$0xff]  ;;  %1033 = vmatpush.bf16.msrb.mxu2 %v1230_v52 }
 0x50d   : > { %v692_v59 = vadd.f32 %v688_v31, %v662_v57  ;;  %1283 = vrcp.f32 %v819_v58  ;;  %v922_v57 = vunpack.c.l.bf16 %v921_v56 }
 0x50f   : > { %693 = vst.msk [vmem:[#allocation5] sm:$0xff] %vm569_vm2, %v692_v59  ;;  %v794_v61 = vpop.f32.mrf.mxu0  ;;  %v923_v58 = vperm.slane %v922_v57, 0 }
 0x510   : > { %v798_v62 = vadd.f32 %v794_v61, %v768_v60  ;;  %1034 = vmatpush.bf16.msrb.mxu2 %v1229_v53 }
 0x512   : > { %799 = vst.msk [vmem:[#allocation5 + $0x8] sm:$0xff] %vm569_vm2, %v798_v62 }
 0x513   : > { %v1284_v63 = vpop.eup %1283 }
 0x514   : > { %823 = vperm.xlu1 %1267, %v1284_v63   ;;  %1035 = vmatpush.bf16.msrb.mxu2 %v1228_v54 }
 0x516   : > { %v808_v2 = vld [vmem:[#allocation5] sm:$0xff] }
 0x517   : > { %v796_v3 = vpop.f32.mrf.mxu0  ;;  %v816_v4 = vmul.f32 %v814_v0, %v808_v2 }
 0x518   : > { %1036 = vmatpush.bf16.msrb.mxu2 %v1227_v55 }
 0x519   : > { %v817_v5 = vpack.c.bf16 %v816_v4, %v816_v4  ;;  %v818_v8 = vld [vmem:[#allocation5 + $0x8] sm:$0xff] }
 0x51b   : > { %1172 = vmatmul.msk.bf16.vlgmr.msra.gmra.mxu0 %vm569_vm2, %v817_v5 }
 0x586   : > { %v824_v7 = vpop.permute.xlu1 %823 }
 0x587   : > { %v826_v10 = vmul.f32 %v824_v7, %v818_v8 }
 0x589   : > { %v827_v11 = vpack.c.bf16 %v826_v10, %v826_v10  ;;  %v978_v10 = vld [vmem:[%s1587_s12] sm:$0x1] }
 0x58b   : > { %1167 = vmatmul.msk.bf16.vlgmr.msra.gmra.mxu2 %vm569_vm2, %v827_v11  ;;  %v979_v11 = vunpack.c.l.bf16 %v978_v10 }
 0x598   : > { %v868_v12 = vpop.f32.mrf.mxu0 }
 0x5a0   : > { %v870_v13 = vpop.f32.mrf.mxu0 }
 0x60e   : > { %v846_v16 = vpop.f32.mrf.mxu2 }
 0x60f   : > { %v869_v17 = vadd.f32 %v868_v12, %v846_v16  ;;  %v980_v12 = vperm.slane %v979_v11, 0 }
 0x611   : > { %v873_v19 = vadd.f32 %v869_v17, %v1416_v1  ;;  %v1226_v1 = vld [vmem:[%s1584_s9 + $0x8] sm:$0xff] }
 0x612   : > { %945 = vmatpush.bf16.msrb.mxu1 %v1226_v1 }
 0x613   : > { %v1509_v20 = vadd.f32 %v876_v18, %v873_v19 }
 0x615   : > { %v881_v21 = vsel %vm493_vm0, %v1509_v20, 0.0 }
 0x616   : > { %v848_v22 = vpop.f32.mrf.mxu2  ;;  %882 = vadd.xlane.f32.xlu1 %v881_v21  ;;  %946 = vmatpush.bf16.msrb.mxu1 %v1225_v29 }
 0x689   : > { %v883_v23 = vpop.xlane.xlu1 %882 }
 0x68a   : > { %v891_v24 = vmul.f32 %v883_v23, %v1420_v9 }
 0x68c   : > { %v892_v26 = vsub.f32 %v1509_v20, %v891_v24 }
 0x68e   : > { %v893_v27 = vmul.f32 %v892_v26, %v892_v26 }
 0x690   : > { %v894_v28 = vsel %vm493_vm0, %v893_v27, 0.0 }
 0x691   : > { %895 = vadd.xlane.f32.xlu2 %v894_v28 }
 0x704   : > { %v896_v31 = vpop.xlane.xlu2 %895 }
 0x705   : > { %v897_v32 = vmul.f32 %v896_v31, %v1420_v9 }
 0x707   : > { %v898_v33 = vadd.f32 1e-05, %v897_v32 }
 0x709   : > { %1285 = vrsqrt.f32 %v898_v33  ;;  %vm905_vm9 = vweird.f32 %v898_v33 }
 0x70f   : > { %v1286_v34 = vpop.eup %1285 }
 0x710   : > { %v900_v35 = vmul.f32 %v1286_v34, %v898_v33  ;;  %vm906_vm8 = vweird.f32 %v1286_v34 }
 0x711   : > { %vm907_vm10 = vmor %vm905_vm9, %vm906_vm8 }
 0x712   : > { %v901_v36 = vmul.f32 %v1286_v34, %v900_v35 }
 0x714   : > { %v902_v38 = vmul.f32 0.5, %v901_v36 }
 0x716   : > { %v903_v41 = vsub.f32 1.5, %v902_v38 }
 0x718   : > { %v904_v9 = vmul.f32 %v1286_v34, %v903_v41 }
 0x71a   : > { %v908_v44 = vsel %vm907_vm10, %v1286_v34, %v904_v9 }
 0x71b   : > { %v909_v45 = vmul.f32 %v908_v44, %v892_v26 }
 0x71d   : > { %v912_v47 = vmul.f32 %v911_v43, %v909_v45 }
 0x71f   : > { %v915_v48 = vadd.f32 %v914_v46, %v912_v47 }
 0x721   : > { %v916_v25 = vpack.c.bf16 %v915_v48, %v915_v48 }
 0x723   : > { %1181 = vmatmul.msk.bf16.vlgmr.msrb.gmra.mxu1 %vm493_vm0, %v916_v25 }
 0x7a0   : > { %v948_v59 = vpop.f32.mrf.mxu1 }
 0x7a1   : > { %v949_v60 = vadd.f32 %v948_v59, %v923_v58 }
 0x7a3   : > { %v952_v61 = vmul.f32 %v949_v60, %v949_v60 }
 0x7a5   : > { %v953_v62 = vmul.f32 %v952_v61, %v949_v60 }
 0x7a7   : > { %v954_v63 = vmul.f32 0.044715, %v953_v62 }
 0x7a8   : > { %v950_v0 = vpop.f32.mrf.mxu1 }
 0x7a9   : > { %v955_v2 = vadd.f32 %v954_v63, %v949_v60 }
 0x7ab   : > { %v956_v3 = vmul.f32 0.7978846, %v955_v2 }
 0x7ad   : > { %1287 = vtanh.f32 %v956_v3 }
 0x7b3   : > { %v1288_v4 = vpop.eup %1287 }
 0x7b4   : > { %v958_v5 = vadd.f32 1.0, %v1288_v4 }
 0x7b6   : > { %v959_v6 = vmul.f32 0.5, %v958_v5 }
 0x7b8   : > { %v960_v7 = vmul.f32 %v959_v6, %v949_v60 }
 0x7ba   : > { %v961_v8 = vpack.c.bf16 %v960_v7, %v960_v7 }
 0x7bc   : > { %1037 = vmatmul.bf16.vlgmr.msrb.gmra.mxu2 %v961_v8 }
 0x83f   : > { %v1038_v13 = vpop.f32.mrf.mxu2 }
 0x840   : > { %v1039_v14 = vadd.f32 %v1038_v13, %v980_v12 }
 0x842   : > { %v1042_v15 = vadd.f32 %v1039_v14, %v1509_v20 }
 0x844   : > { %v1043_v16 = vpack.c.bf16 %v1042_v15, %v1042_v15 }
 0x846   : > { %1045 = vst.msk [vmem:[%s483_s19] sm:$0xf] %vm1044_vm11, %v1043_v16 }
 0x847   : > { %v1040_v17 = vpop.f32.mrf.mxu2 }
 0x848 PF: > { %s23_s27 = sadd.s32 1, %s1311_s27   ;;  %s1589_s25 = smov %s1307_s26 }
 0x849   : > { %p20_p5 = scmp.ge.s32.totalorder %s23_s27, 4   ;;  %s1590_s26 = smov %s1592_s28 }
 0x84b   :  { %22 = sbr.rel (!%p20_p5) target bundleno = 2 (0x2), region = 116 }

</bundles_post_ra>
